<compile_context>
chip_gen: v7x
topology: tpu7x:2x2x1
jax: 0.10.0
libtpu: 0.0.40
codegen_flags: <defaults>
</compile_context>

<pallas_src>
import functools

import jax
import jax.numpy as jnp
from jax.experimental import pallas as pl
from jax.experimental.pallas import tpu as pltpu


# ---------------------------------------------------------------------------
# Fused kernel: one grid step = (batch element b, layer l)
#   l == 0      : x = tok_emb * sqrt(H) + pos_emb          (embedding combine)
#   every l     : x = EncoderLayer_l(x, mask)              (MHA + FFN + 2x LN)
#   l == L - 1  : out[b] = x                               (single writeback)
# ---------------------------------------------------------------------------
def _fused_encoder_kernel(
    tok_ref, pos_ref, amask_ref,
    wq_ref, bq_ref, wk_ref, bk_ref, wv_ref, bv_ref,
    wo_ref, bo_ref, g_ref, beta_ref,
    w1_ref, b1_ref, w2_ref, b2_ref,
    out_ref,
    x_ref,                         # VMEM scratch (S, H): activation carry
    *, n_heads, head_dim, emb_scale, eps,
):
    l = pl.program_id(1)
    n_layers = pl.num_programs(1)

    @pl.when(l == 0)
    def _():
        # embedding combine (dropout = identity in eval mode)
        x_ref[...] = tok_ref[0] * jnp.float32(emb_scale) + pos_ref[...]

    x = x_ref[...]                                   # (S, H)
    S, H = x.shape
    inv_scale = jnp.float32(1.0 / (float(head_dim) ** 0.5))

    amask = amask_ref[0]                             # (1, S) additive key mask
    wq, wk, wv = wq_ref[0], wk_ref[0], wv_ref[0]     # (nh, H, hd)
    bq, bk, bv = bq_ref[0], bk_ref[0], bv_ref[0]     # (nh, 1, hd)
    wo = wo_ref[0]                                   # (nh, hd, H)
    bo = bo_ref[0]                                   # (1, H)
    g, beta = g_ref[0], beta_ref[0]                  # (1, H)

    # ---- multi-head self-attention (heads batched, no concat) -------------
    xh = jnp.broadcast_to(x[None], (n_heads, S, H))  # (nh, S, H)
    q = jnp.einsum("hsk,hkd->hsd", xh, wq, preferred_element_type=jnp.float32) + bq
    k = jnp.einsum("hsk,hkd->hsd", xh, wk, preferred_element_type=jnp.float32) + bk
    v = jnp.einsum("hsk,hkd->hsd", xh, wv, preferred_element_type=jnp.float32) + bv

    e = jnp.einsum("hqd,hkd->hqk", q, k, preferred_element_type=jnp.float32) * inv_scale
    e = e + amask[None]                              # masked keys -> -1e10
    e = e - jnp.max(e, axis=-1, keepdims=True)
    p = jnp.exp(e)
    p = p * pl.reciprocal(jnp.sum(p, axis=-1, keepdims=True), approx=True)
    ctx = jnp.einsum("hqk,hkd->hqd", p, v, preferred_element_type=jnp.float32)  # (nh,S,hd)

    # head merge + output projection: batched matmul, then sum over head axis
    sa = jnp.sum(
        jnp.einsum("hqd,hdm->hqm", ctx, wo, preferred_element_type=jnp.float32),
        axis=0,
    ) + bo                                            # (S, H)

    def layer_norm(y):
        mu = jnp.mean(y, axis=-1, keepdims=True)
        var = jnp.mean((y - mu) * (y - mu), axis=-1, keepdims=True)
        return (y - mu) * jax.lax.rsqrt(var + eps) * g + beta

    h1 = layer_norm(x + sa)

    # ---- positionwise feed-forward -----------------------------------------
    f = jnp.maximum(
        jnp.dot(h1, w1_ref[0], preferred_element_type=jnp.float32) + b1_ref[0], 0.0
    )
    f = jnp.dot(f, w2_ref[0], preferred_element_type=jnp.float32) + b2_ref[0]
    y = layer_norm(h1 + f)

    x_ref[...] = y                                    # carry to next layer

    @pl.when(l == n_layers - 1)
    def _():
        out_ref[0] = y                                # single HBM writeback per b


# ---------------------------------------------------------------------------
# Wrapper: gathers (plain-JAX glue), weight stacking/head-splitting, one call.
# ---------------------------------------------------------------------------
def attn_encoder_forward(src, src_mask, params, n_heads):
    """src: (B,S) int32 token ids; src_mask: (B,S) float32 (1 keep / 0 mask)."""
    B, S = src.shape
    H = params["tok_emb"].shape[1]
    L = len(params["layers"])
    hd = H // n_heads
    PF = params["layers"][0]["w1"].shape[1]

    # Embedding gathers: plain-JAX glue (tiny tables, no clean Pallas gather here).
    tok_emb = jnp.take(params["tok_emb"], src, axis=0)                            # (B,S,H)
    pos_emb = jnp.take(params["pos_emb"], jnp.arange(S, dtype=jnp.int32), axis=0)  # (S,H)

    # Additive key mask: 0 where kept, -1e10 where masked.
    amask = ((src_mask.astype(jnp.float32) - 1.0) * jnp.float32(1e10)).reshape(B, 1, S)

    def stack(name):
        return jnp.stack([lp[name] for lp in params["layers"]], axis=0)

    # Pre-split heads on the weights (free wrapper-side reshapes).
    wq_s = stack("wq").reshape(L, H, n_heads, hd).transpose(0, 2, 1, 3)   # (L,nh,H,hd)
    wk_s = stack("wk").reshape(L, H, n_heads, hd).transpose(0, 2, 1, 3)
    wv_s = stack("wv").reshape(L, H, n_heads, hd).transpose(0, 2, 1, 3)
    bq_s = stack("bq").reshape(L, n_heads, 1, hd)                         # (L,nh,1,hd)
    bk_s = stack("bk").reshape(L, n_heads, 1, hd)
    bv_s = stack("bv").reshape(L, n_heads, 1, hd)
    wo_s = stack("wo").reshape(L, n_heads, hd, H)                         # (L,nh,hd,H)
    bo_s = stack("bo").reshape(L, 1, H)
    g_s  = stack("ln_g").reshape(L, 1, H)
    b_s  = stack("ln_b").reshape(L, 1, H)
    w1_s = stack("w1")                                                    # (L,H,PF)
    b1_s = stack("b1").reshape(L, 1, PF)
    w2_s = stack("w2")                                                    # (L,PF,H)
    b2_s = stack("b2").reshape(L, 1, H)

    weight_args = [wq_s, bq_s, wk_s, bk_s, wv_s, bv_s, wo_s, bo_s,
                   g_s, b_s, w1_s, b1_s, w2_s, b2_s]

    def per_layer(arr):
        nd = arr.ndim
        return pl.BlockSpec(
            (1,) + arr.shape[1:], lambda b, l, _nd=nd: (l,) + (0,) * (_nd - 1)
        )

    kernel = functools.partial(
        _fused_encoder_kernel,
        n_heads=n_heads, head_dim=hd, emb_scale=float(H) ** 0.5, eps=1e-5,
    )

    grid_spec = pltpu.PrefetchScalarGridSpec(
        num_scalar_prefetch=0,
        grid=(B, L),
        in_specs=[
            pl.BlockSpec((1, S, H), lambda b, l: (b, 0, 0)),   # tok_emb[b]
            pl.BlockSpec((S, H), lambda b, l: (0, 0)),         # pos_emb (shared)
            pl.BlockSpec((1, 1, S), lambda b, l: (b, 0, 0)),   # additive mask[b]
        ] + [per_layer(w) for w in weight_args],
        out_specs=pl.BlockSpec((1, S, H), lambda b, l: (b, 0, 0)),
        scratch_shapes=[pltpu.VMEM((S, H), jnp.float32)],
    )

    return pl.pallas_call(
        kernel,
        out_shape=jax.ShapeDtypeStruct((B, S, H), jnp.float32),
        grid_spec=grid_spec,
        compiler_params=pltpu.CompilerParams(
            dimension_semantics=("parallel", "arbitrary")
        ),
    )(tok_emb, pos_emb, amask, *weight_args)


# ---------------------------------------------------------------------------
# Pure-JAX reference (same math) for validation
# ---------------------------------------------------------------------------
def reference_forward(src, src_mask, params, n_heads):
    B, S = src.shape
    H = params["tok_emb"].shape[1]
    hd = H // n_heads
    x = (
        jnp.take(params["tok_emb"], src, axis=0) * jnp.float32(H) ** 0.5
        + jnp.take(params["pos_emb"], jnp.arange(S), axis=0)[None]
    )
    mask = src_mask[:, None, None, :]
    for p in params["layers"]:
        q = (x @ p["wq"] + p["bq"]).reshape(B, S, n_heads, hd).transpose(0, 2, 1, 3)
        k = (x @ p["wk"] + p["bk"]).reshape(B, S, n_heads, hd).transpose(0, 2, 1, 3)
        v = (x @ p["wv"] + p["bv"]).reshape(B, S, n_heads, hd).transpose(0, 2, 1, 3)
        e = jnp.einsum("bhqd,bhkd->bhqk", q, k) / jnp.float32(hd) ** 0.5
        e = jnp.where(mask > 0, e, -1e10)
        a = jax.nn.softmax(e, axis=-1)
        ctx = jnp.einsum("bhqk,bhkd->bhqd", a, v).transpose(0, 2, 1, 3).reshape(B, S, H)
        sa = ctx @ p["wo"] + p["bo"]

        def ln(y):
            mu = y.mean(-1, keepdims=True)
            var = ((y - mu) ** 2).mean(-1, keepdims=True)
            return (y - mu) * jax.lax.rsqrt(var + 1e-5) * p["ln_g"] + p["ln_b"]

        h = ln(x + sa)
        f = jnp.maximum(h @ p["w1"] + p["b1"], 0.0) @ p["w2"] + p["b2"]
        x = ln(h + f)
    return x


# ---------------------------------------------------------------------------
# Deterministic parameter init (synthetic; no checkpoint loading)
# ---------------------------------------------------------------------------
def init_params(key, input_dim, hid_dim, n_layers, pf_dim):
    def nrm(k, shape, s=0.05):
        return jax.random.normal(k, shape, dtype=jnp.float32) * s

    keys = jax.random.split(key, 2 + n_layers)
    params = {
        "tok_emb": nrm(keys[0], (input_dim, hid_dim), 0.1),
        "pos_emb": nrm(keys[1], (input_dim, hid_dim), 0.1),
        "layers": [],
    }
    for li in range(n_layers):
        lk = jax.random.split(keys[2 + li], 8)
        params["layers"].append({
            "wq": nrm(lk[0], (hid_dim, hid_dim)), "bq": nrm(lk[1], (1, hid_dim)),
            "wk": nrm(lk[2], (hid_dim, hid_dim)), "bk": nrm(lk[3], (1, hid_dim)),
            "wv": nrm(lk[4], (hid_dim, hid_dim)), "bv": nrm(lk[5], (1, hid_dim)),
            "wo": nrm(lk[6], (hid_dim, hid_dim)), "bo": jnp.zeros((1, hid_dim), jnp.float32),
            "ln_g": jnp.ones((1, hid_dim), jnp.float32),
            "ln_b": jnp.zeros((1, hid_dim), jnp.float32),
            "w1": nrm(lk[7], (hid_dim, pf_dim)), "b1": jnp.zeros((1, pf_dim), jnp.float32),
            "w2": nrm(jax.random.fold_in(lk[7], 1), (pf_dim, hid_dim)),
            "b2": jnp.zeros((1, hid_dim), jnp.float32),
        })
    return params


if __name__ == "__main__":
    INPUT_DIM = 50   # vocab size (also used for pos embedding table, as in the module)
    HID_DIM = 32
    N_LAYERS = 2
    N_HEADS = 4
    PF_DIM = 64
    B, S = 2, 8

    key = jax.random.PRNGKey(0)
    k_p, k_src = jax.random.split(key)
    params = init_params(k_p, INPUT_DIM, HID_DIM, N_LAYERS, PF_DIM)

    src = jax.random.randint(k_src, (B, S), 0, INPUT_DIM, dtype=jnp.int32)
    src_mask = jnp.ones((B, S), jnp.float32).at[1, -2:].set(0.0)  # mask last 2 keys of batch 1

    out = attn_encoder_forward(src, src_mask, params, N_HEADS)
    out = jax.block_until_ready(out)

    ref = reference_forward(src, src_mask, params, N_HEADS)
    assert out.shape == (B, S, HID_DIM)
    # tolerance covers the approx EUP reciprocal in the softmax denominator
    assert jnp.allclose(out, ref, atol=2e-3, rtol=2e-3), float(jnp.max(jnp.abs(out - ref)))

    print("KERNEL_OK")
</pallas_src>

<mosaic_0001>
module attributes {stable_mosaic.version = 11 : i64} {
  func.func @_fused_encoder_kernel(%arg0: i32, %arg1: i32, %arg2: memref<1x8x32xf32, #tpu.memory_space<vmem>>, %arg3: memref<8x32xf32, #tpu.memory_space<vmem>>, %arg4: memref<1x1x8xf32, #tpu.memory_space<vmem>>, %arg5: memref<1x4x32x8xf32, #tpu.memory_space<vmem>>, %arg6: memref<1x4x1x8xf32, #tpu.memory_space<vmem>>, %arg7: memref<1x4x32x8xf32, #tpu.memory_space<vmem>>, %arg8: memref<1x4x1x8xf32, #tpu.memory_space<vmem>>, %arg9: memref<1x4x32x8xf32, #tpu.memory_space<vmem>>, %arg10: memref<1x4x1x8xf32, #tpu.memory_space<vmem>>, %arg11: memref<1x4x8x32xf32, #tpu.memory_space<vmem>>, %arg12: memref<1x1x32xf32, #tpu.memory_space<vmem>>, %arg13: memref<1x1x32xf32, #tpu.memory_space<vmem>>, %arg14: memref<1x1x32xf32, #tpu.memory_space<vmem>>, %arg15: memref<1x32x64xf32, #tpu.memory_space<vmem>>, %arg16: memref<1x1x64xf32, #tpu.memory_space<vmem>>, %arg17: memref<1x64x32xf32, #tpu.memory_space<vmem>>, %arg18: memref<1x1x32xf32, #tpu.memory_space<vmem>>, %arg19: memref<1x8x32xf32, #tpu.memory_space<vmem>>, %arg20: memref<8x32xf32, #tpu.memory_space<vmem>>) attributes {dimension_semantics = [#tpu.dimension_semantics<parallel>, #tpu.dimension_semantics<arbitrary>], iteration_bounds = array<i64: 2, 2>, scalar_prefetch = 0 : i64, scratch_operands = 1 : i64, tpu.core_type = #tpu.core_type<tc>, window_params = [{transform_indices = @transform_0, window_bounds = array<i64: 1, 8, 32>}, {pipeline_mode = #tpu.pipeline_mode<synchronous>, transform_indices = @transform_1, window_bounds = array<i64: 8, 32>}, {transform_indices = @transform_2, window_bounds = array<i64: 1, 1, 8>}, {transform_indices = @transform_3, window_bounds = array<i64: 1, 4, 32, 8>}, {transform_indices = @transform_4, window_bounds = array<i64: 1, 4, 1, 8>}, {transform_indices = @transform_5, window_bounds = array<i64: 1, 4, 32, 8>}, {transform_indices = @transform_6, window_bounds = array<i64: 1, 4, 1, 8>}, {transform_indices = @transform_7, window_bounds = array<i64: 1, 4, 32, 8>}, {transform_indices = @transform_8, window_bounds = array<i64: 1, 4, 1, 8>}, {transform_indices = @transform_9, window_bounds = array<i64: 1, 4, 8, 32>}, {transform_indices = @transform_10, window_bounds = array<i64: 1, 1, 32>}, {transform_indices = @transform_11, window_bounds = array<i64: 1, 1, 32>}, {transform_indices = @transform_12, window_bounds = array<i64: 1, 1, 32>}, {transform_indices = @transform_13, window_bounds = array<i64: 1, 32, 64>}, {transform_indices = @transform_14, window_bounds = array<i64: 1, 1, 64>}, {transform_indices = @transform_15, window_bounds = array<i64: 1, 64, 32>}, {transform_indices = @transform_16, window_bounds = array<i64: 1, 1, 32>}, {transform_indices = @transform_17, window_bounds = array<i64: 1, 8, 32>}]} {
    %c0_i32 = arith.constant 0 : i32
    %0 = arith.cmpi eq, %arg1, %c0_i32 : i32
    %1 = arith.extui %0 : i1 to i32
    %c0_i32_0 = arith.constant 0 : i32
    %2 = arith.cmpi ne, %1, %c0_i32_0 : i32
    scf.if %2 {
      %c0_79 = arith.constant 0 : index
      %c0_80 = arith.constant 0 : index
      %c0_81 = arith.constant 0 : index
      %129 = vector.load %arg2[%c0_79, %c0_80, %c0_81] : memref<1x8x32xf32, #tpu.memory_space<vmem>>, vector<1x8x32xf32>
      %130 = vector.shape_cast %129 : vector<1x8x32xf32> to vector<8x32xf32>
      %cst_82 = arith.constant 5.65685415 : f32
      %131 = vector.broadcast %cst_82 : f32 to vector<8x32xf32>
      %132 = arith.mulf %130, %131 : vector<8x32xf32>
      %c0_83 = arith.constant 0 : index
      %c0_84 = arith.constant 0 : index
      %133 = vector.load %arg3[%c0_83, %c0_84] : memref<8x32xf32, #tpu.memory_space<vmem>>, vector<8x32xf32>
      %134 = arith.addf %132, %133 : vector<8x32xf32>
      %c0_85 = arith.constant 0 : index
      %c0_86 = arith.constant 0 : index
      %135 = vector.load %arg20[%c0_85, %c0_86] : memref<8x32xf32, #tpu.memory_space<vmem>>, vector<8x32xf32>
      tpu.vector_store %arg20[%c0_85, %c0_86], %134 {strides = array<i32>} : memref<8x32xf32, #tpu.memory_space<vmem>>, vector<8x32xf32>,
    } else {
    }
    %c0 = arith.constant 0 : index
    %c0_1 = arith.constant 0 : index
    %3 = vector.load %arg20[%c0, %c0_1] : memref<8x32xf32, #tpu.memory_space<vmem>>, vector<8x32xf32>
    %c0_2 = arith.constant 0 : index
    %c0_3 = arith.constant 0 : index
    %c0_4 = arith.constant 0 : index
    %4 = vector.load %arg4[%c0_2, %c0_3, %c0_4] : memref<1x1x8xf32, #tpu.memory_space<vmem>>, vector<1x1x8xf32>
    %5 = vector.shape_cast %4 : vector<1x1x8xf32> to vector<1x8xf32>
    %c0_5 = arith.constant 0 : index
    %c0_6 = arith.constant 0 : index
    %c0_7 = arith.constant 0 : index
    %c0_8 = arith.constant 0 : index
    %6 = vector.load %arg5[%c0_5, %c0_6, %c0_7, %c0_8] : memref<1x4x32x8xf32, #tpu.memory_space<vmem>>, vector<1x4x32x8xf32>
    %7 = vector.shape_cast %6 : vector<1x4x32x8xf32> to vector<4x32x8xf32>
    %c0_9 = arith.constant 0 : index
    %c0_10 = arith.constant 0 : index
    %c0_11 = arith.constant 0 : index
    %c0_12 = arith.constant 0 : index
    %8 = vector.load %arg7[%c0_9, %c0_10, %c0_11, %c0_12] : memref<1x4x32x8xf32, #tpu.memory_space<vmem>>, vector<1x4x32x8xf32>
    %9 = vector.shape_cast %8 : vector<1x4x32x8xf32> to vector<4x32x8xf32>
    %c0_13 = arith.constant 0 : index
    %c0_14 = arith.constant 0 : index
    %c0_15 = arith.constant 0 : index
    %c0_16 = arith.constant 0 : index
    %10 = vector.load %arg9[%c0_13, %c0_14, %c0_15, %c0_16] : memref<1x4x32x8xf32, #tpu.memory_space<vmem>>, vector<1x4x32x8xf32>
    %11 = vector.shape_cast %10 : vector<1x4x32x8xf32> to vector<4x32x8xf32>
    %c0_17 = arith.constant 0 : index
    %c0_18 = arith.constant 0 : index
    %c0_19 = arith.constant 0 : index
    %c0_20 = arith.constant 0 : index
    %12 = vector.load %arg6[%c0_17, %c0_18, %c0_19, %c0_20] : memref<1x4x1x8xf32, #tpu.memory_space<vmem>>, vector<1x4x1x8xf32>
    %13 = vector.shape_cast %12 : vector<1x4x1x8xf32> to vector<4x1x8xf32>
    %c0_21 = arith.constant 0 : index
    %c0_22 = arith.constant 0 : index
    %c0_23 = arith.constant 0 : index
    %c0_24 = arith.constant 0 : index
    %14 = vector.load %arg8[%c0_21, %c0_22, %c0_23, %c0_24] : memref<1x4x1x8xf32, #tpu.memory_space<vmem>>, vector<1x4x1x8xf32>
    %15 = vector.shape_cast %14 : vector<1x4x1x8xf32> to vector<4x1x8xf32>
    %c0_25 = arith.constant 0 : index
    %c0_26 = arith.constant 0 : index
    %c0_27 = arith.constant 0 : index
    %c0_28 = arith.constant 0 : index
    %16 = vector.load %arg10[%c0_25, %c0_26, %c0_27, %c0_28] : memref<1x4x1x8xf32, #tpu.memory_space<vmem>>, vector<1x4x1x8xf32>
    %17 = vector.shape_cast %16 : vector<1x4x1x8xf32> to vector<4x1x8xf32>
    %c0_29 = arith.constant 0 : index
    %c0_30 = arith.constant 0 : index
    %c0_31 = arith.constant 0 : index
    %c0_32 = arith.constant 0 : index
    %18 = vector.load %arg11[%c0_29, %c0_30, %c0_31, %c0_32] : memref<1x4x8x32xf32, #tpu.memory_space<vmem>>, vector<1x4x8x32xf32>
    %19 = vector.shape_cast %18 : vector<1x4x8x32xf32> to vector<4x8x32xf32>
    %c0_33 = arith.constant 0 : index
    %c0_34 = arith.constant 0 : index
    %c0_35 = arith.constant 0 : index
    %20 = vector.load %arg12[%c0_33, %c0_34, %c0_35] : memref<1x1x32xf32, #tpu.memory_space<vmem>>, vector<1x1x32xf32>
    %21 = vector.shape_cast %20 : vector<1x1x32xf32> to vector<1x32xf32>
    %c0_36 = arith.constant 0 : index
    %c0_37 = arith.constant 0 : index
    %c0_38 = arith.constant 0 : index
    %22 = vector.load %arg13[%c0_36, %c0_37, %c0_38] : memref<1x1x32xf32, #tpu.memory_space<vmem>>, vector<1x1x32xf32>
    %23 = vector.shape_cast %22 : vector<1x1x32xf32> to vector<1x32xf32>
    %c0_39 = arith.constant 0 : index
    %c0_40 = arith.constant 0 : index
    %c0_41 = arith.constant 0 : index
    %24 = vector.load %arg14[%c0_39, %c0_40, %c0_41] : memref<1x1x32xf32, #tpu.memory_space<vmem>>, vector<1x1x32xf32>
    %25 = vector.shape_cast %24 : vector<1x1x32xf32> to vector<1x32xf32>
    %26 = vector.shape_cast %3 : vector<8x32xf32> to vector<1x8x32xf32>
    %27 = vector.shape_cast %26 : vector<1x8x32xf32> to vector<1x8x32xf32>
    %28 = vector.broadcast %27 : vector<1x8x32xf32> to vector<4x8x32xf32>
    "tpu.trace_start"() <{level = 10 : i32, message = "hsk,hkd->hsd"}> : () -> ()
    %cst = arith.constant dense<0.000000e+00> : vector<4x8x8xf32>
    %29 = tpu.matmul %28, %7, %cst {dimension_numbers = #tpu.dot_dimension_numbers<[2], [1], [1], [2], [0, 0, 0, 1, 1, 2], [0], [0]>} : vector<4x8x32xf32>, vector<4x32x8xf32>, vector<4x8x8xf32> -> vector<4x8x8xf32>
    "tpu.trace_stop"() : () -> ()
    %30 = vector.broadcast %13 : vector<4x1x8xf32> to vector<4x8x8xf32>
    %31 = arith.addf %29, %30 : vector<4x8x8xf32>
    "tpu.trace_start"() <{level = 10 : i32, message = "hsk,hkd->hsd"}> : () -> ()
    %cst_42 = arith.constant dense<0.000000e+00> : vector<4x8x8xf32>
    %32 = tpu.matmul %28, %9, %cst_42 {dimension_numbers = #tpu.dot_dimension_numbers<[2], [1], [1], [2], [0, 0, 0, 1, 1, 2], [0], [0]>} : vector<4x8x32xf32>, vector<4x32x8xf32>, vector<4x8x8xf32> -> vector<4x8x8xf32>
    "tpu.trace_stop"() : () -> ()
    %33 = vector.broadcast %15 : vector<4x1x8xf32> to vector<4x8x8xf32>
    %34 = arith.addf %32, %33 : vector<4x8x8xf32>
    "tpu.trace_start"() <{level = 10 : i32, message = "hsk,hkd->hsd"}> : () -> ()
    %cst_43 = arith.constant dense<0.000000e+00> : vector<4x8x8xf32>
    %35 = tpu.matmul %28, %11, %cst_43 {dimension_numbers = #tpu.dot_dimension_numbers<[2], [1], [1], [2], [0, 0, 0, 1, 1, 2], [0], [0]>} : vector<4x8x32xf32>, vector<4x32x8xf32>, vector<4x8x8xf32> -> vector<4x8x8xf32>
    "tpu.trace_stop"() : () -> ()
    %36 = vector.broadcast %17 : vector<4x1x8xf32> to vector<4x8x8xf32>
    %37 = arith.addf %35, %36 : vector<4x8x8xf32>
    "tpu.trace_start"() <{level = 10 : i32, message = "hqd,hkd->hqk"}> : () -> ()
    %cst_44 = arith.constant dense<0.000000e+00> : vector<4x8x8xf32>
    %38 = tpu.matmul %31, %34, %cst_44 {dimension_numbers = #tpu.dot_dimension_numbers<[2], [2], [1], [1], [0, 0, 0, 1, 1, 1], [0], [0]>} : vector<4x8x8xf32>, vector<4x8x8xf32>, vector<4x8x8xf32> -> vector<4x8x8xf32>
    "tpu.trace_stop"() : () -> ()
    %cst_45 = arith.constant 0.353553385 : f32
    %39 = vector.broadcast %cst_45 : f32 to vector<4x8x8xf32>
    %40 = arith.mulf %38, %39 : vector<4x8x8xf32>
    %41 = vector.shape_cast %5 : vector<1x8xf32> to vector<1x1x8xf32>
    %42 = vector.broadcast %41 : vector<1x1x8xf32> to vector<4x8x8xf32>
    %43 = arith.addf %40, %42 : vector<4x8x8xf32>
    %cst_46 = arith.constant dense<0xFF800000> : vector<4x8xf32>
    %44 = vector.multi_reduction <maximumf>, %43, %cst_46 [2] : vector<4x8x8xf32> to vector<4x8xf32>
    %45 = vector.shape_cast %44 : vector<4x8xf32> to vector<4x8x1xf32>
    %46 = vector.broadcast %45 : vector<4x8x1xf32> to vector<4x8x8xf32>
    %47 = arith.subf %43, %46 : vector<4x8x8xf32>
    %48 = math.exp %47 : vector<4x8x8xf32>
    %cst_47 = arith.constant dense<0.000000e+00> : vector<4x8xf32>
    %49 = vector.multi_reduction <add>, %48, %cst_47 [2] : vector<4x8x8xf32> to vector<4x8xf32>
    %50 = vector.shape_cast %49 : vector<4x8xf32> to vector<4x8x1xf32>
    %51 = tpu.reciprocal %50 {approx = true} : vector<4x8x1xf32> -> vector<4x8x1xf32>
    %52 = vector.broadcast %51 : vector<4x8x1xf32> to vector<4x8x8xf32>
    %53 = arith.mulf %48, %52 : vector<4x8x8xf32>
    "tpu.trace_start"() <{level = 10 : i32, message = "hqk,hkd->hqd"}> : () -> ()
    %cst_48 = arith.constant dense<0.000000e+00> : vector<4x8x8xf32>
    %54 = tpu.matmul %53, %37, %cst_48 {dimension_numbers = #tpu.dot_dimension_numbers<[2], [1], [1], [2], [0, 0, 0, 1, 1, 2], [0], [0]>} : vector<4x8x8xf32>, vector<4x8x8xf32>, vector<4x8x8xf32> -> vector<4x8x8xf32>
    "tpu.trace_stop"() : () -> ()
    "tpu.trace_start"() <{level = 10 : i32, message = "hqd,hdm->hqm"}> : () -> ()
    %cst_49 = arith.constant dense<0.000000e+00> : vector<4x8x32xf32>
    %55 = tpu.matmul %54, %19, %cst_49 {dimension_numbers = #tpu.dot_dimension_numbers<[2], [1], [1], [2], [0, 0, 0, 1, 1, 2], [0], [0]>} : vector<4x8x8xf32>, vector<4x8x32xf32>, vector<4x8x32xf32> -> vector<4x8x32xf32>
    "tpu.trace_stop"() : () -> ()
    %cst_50 = arith.constant dense<0.000000e+00> : vector<8x32xf32>
    %56 = vector.multi_reduction <add>, %55, %cst_50 [0] : vector<4x8x32xf32> to vector<8x32xf32>
    %57 = vector.broadcast %21 : vector<1x32xf32> to vector<8x32xf32>
    %58 = arith.addf %56, %57 : vector<8x32xf32>
    %59 = arith.addf %3, %58 : vector<8x32xf32>
    %cst_51 = arith.constant dense<0.000000e+00> : vector<8xf32>
    %60 = vector.multi_reduction <add>, %59, %cst_51 [1] : vector<8x32xf32> to vector<8xf32>
    %61 = vector.shape_cast %60 : vector<8xf32> to vector<8x1xf32>
    %cst_52 = arith.constant 3.200000e+01 : f32
    %62 = vector.broadcast %cst_52 : f32 to vector<8x1xf32>
    %63 = arith.divf %61, %62 : vector<8x1xf32>
    %64 = vector.broadcast %63 : vector<8x1xf32> to vector<8x32xf32>
    %65 = arith.subf %59, %64 : vector<8x32xf32>
    %66 = vector.broadcast %63 : vector<8x1xf32> to vector<8x32xf32>
    %67 = arith.subf %59, %66 : vector<8x32xf32>
    %68 = arith.mulf %65, %67 : vector<8x32xf32>
    %cst_53 = arith.constant dense<0.000000e+00> : vector<8xf32>
    %69 = vector.multi_reduction <add>, %68, %cst_53 [1] : vector<8x32xf32> to vector<8xf32>
    %70 = vector.shape_cast %69 : vector<8xf32> to vector<8x1xf32>
    %cst_54 = arith.constant 3.200000e+01 : f32
    %71 = vector.broadcast %cst_54 : f32 to vector<8x1xf32>
    %72 = arith.divf %70, %71 : vector<8x1xf32>
    %73 = vector.broadcast %63 : vector<8x1xf32> to vector<8x32xf32>
    %74 = arith.subf %59, %73 : vector<8x32xf32>
    %cst_55 = arith.constant 9.99999974E-6 : f32
    %75 = vector.broadcast %cst_55 : f32 to vector<8x1xf32>
    %76 = arith.addf %72, %75 : vector<8x1xf32>
    %77 = math.rsqrt %76 : vector<8x1xf32>
    %78 = vector.broadcast %77 : vector<8x1xf32> to vector<8x32xf32>
    %79 = arith.mulf %74, %78 : vector<8x32xf32>
    %80 = vector.broadcast %23 : vector<1x32xf32> to vector<8x32xf32>
    %81 = arith.mulf %79, %80 : vector<8x32xf32>
    %82 = vector.broadcast %25 : vector<1x32xf32> to vector<8x32xf32>
    %83 = arith.addf %81, %82 : vector<8x32xf32>
    %c0_56 = arith.constant 0 : index
    %c0_57 = arith.constant 0 : index
    %c0_58 = arith.constant 0 : index
    %84 = vector.load %arg15[%c0_56, %c0_57, %c0_58] : memref<1x32x64xf32, #tpu.memory_space<vmem>>, vector<1x32x64xf32>
    %85 = vector.shape_cast %84 : vector<1x32x64xf32> to vector<32x64xf32>
    %cst_59 = arith.constant dense<0.000000e+00> : vector<8x64xf32>
    %86 = tpu.matmul %83, %85, %cst_59 {dimension_numbers = #tpu.dot_dimension_numbers<[1], [0], [0], [1], [0, 0, 1, 1], [], []>} : vector<8x32xf32>, vector<32x64xf32>, vector<8x64xf32> -> vector<8x64xf32>
    %c0_60 = arith.constant 0 : index
    %c0_61 = arith.constant 0 : index
    %c0_62 = arith.constant 0 : index
    %87 = vector.load %arg16[%c0_60, %c0_61, %c0_62] : memref<1x1x64xf32, #tpu.memory_space<vmem>>, vector<1x1x64xf32>
    %88 = vector.shape_cast %87 : vector<1x1x64xf32> to vector<1x64xf32>
    %89 = vector.broadcast %88 : vector<1x64xf32> to vector<8x64xf32>
    %90 = arith.addf %86, %89 : vector<8x64xf32>
    %cst_63 = arith.constant 0.000000e+00 : f32
    %91 = vector.broadcast %cst_63 : f32 to vector<8x64xf32>
    %92 = arith.maximumf %90, %91 : vector<8x64xf32>
    %c0_64 = arith.constant 0 : index
    %c0_65 = arith.constant 0 : index
    %c0_66 = arith.constant 0 : index
    %93 = vector.load %arg17[%c0_64, %c0_65, %c0_66] : memref<1x64x32xf32, #tpu.memory_space<vmem>>, vector<1x64x32xf32>
    %94 = vector.shape_cast %93 : vector<1x64x32xf32> to vector<64x32xf32>
    %cst_67 = arith.constant dense<0.000000e+00> : vector<8x32xf32>
    %95 = tpu.matmul %92, %94, %cst_67 {dimension_numbers = #tpu.dot_dimension_numbers<[1], [0], [0], [1], [0, 0, 1, 1], [], []>} : vector<8x64xf32>, vector<64x32xf32>, vector<8x32xf32> -> vector<8x32xf32>
    %c0_68 = arith.constant 0 : index
    %c0_69 = arith.constant 0 : index
    %c0_70 = arith.constant 0 : index
    %96 = vector.load %arg18[%c0_68, %c0_69, %c0_70] : memref<1x1x32xf32, #tpu.memory_space<vmem>>, vector<1x1x32xf32>
    %97 = vector.shape_cast %96 : vector<1x1x32xf32> to vector<1x32xf32>
    %98 = vector.broadcast %97 : vector<1x32xf32> to vector<8x32xf32>
    %99 = arith.addf %95, %98 : vector<8x32xf32>
    %100 = arith.addf %83, %99 : vector<8x32xf32>
    %cst_71 = arith.constant dense<0.000000e+00> : vector<8xf32>
    %101 = vector.multi_reduction <add>, %100, %cst_71 [1] : vector<8x32xf32> to vector<8xf32>
    %102 = vector.shape_cast %101 : vector<8xf32> to vector<8x1xf32>
    %cst_72 = arith.constant 3.200000e+01 : f32
    %103 = vector.broadcast %cst_72 : f32 to vector<8x1xf32>
    %104 = arith.divf %102, %103 : vector<8x1xf32>
    %105 = vector.broadcast %104 : vector<8x1xf32> to vector<8x32xf32>
    %106 = arith.subf %100, %105 : vector<8x32xf32>
    %107 = vector.broadcast %104 : vector<8x1xf32> to vector<8x32xf32>
    %108 = arith.subf %100, %107 : vector<8x32xf32>
    %109 = arith.mulf %106, %108 : vector<8x32xf32>
    %cst_73 = arith.constant dense<0.000000e+00> : vector<8xf32>
    %110 = vector.multi_reduction <add>, %109, %cst_73 [1] : vector<8x32xf32> to vector<8xf32>
    %111 = vector.shape_cast %110 : vector<8xf32> to vector<8x1xf32>
    %cst_74 = arith.constant 3.200000e+01 : f32
    %112 = vector.broadcast %cst_74 : f32 to vector<8x1xf32>
    %113 = arith.divf %111, %112 : vector<8x1xf32>
    %114 = vector.broadcast %104 : vector<8x1xf32> to vector<8x32xf32>
    %115 = arith.subf %100, %114 : vector<8x32xf32>
    %cst_75 = arith.constant 9.99999974E-6 : f32
    %116 = vector.broadcast %cst_75 : f32 to vector<8x1xf32>
    %117 = arith.addf %113, %116 : vector<8x1xf32>
    %118 = math.rsqrt %117 : vector<8x1xf32>
    %119 = vector.broadcast %118 : vector<8x1xf32> to vector<8x32xf32>
    %120 = arith.mulf %115, %119 : vector<8x32xf32>
    %121 = vector.broadcast %23 : vector<1x32xf32> to vector<8x32xf32>
    %122 = arith.mulf %120, %121 : vector<8x32xf32>
    %123 = vector.broadcast %25 : vector<1x32xf32> to vector<8x32xf32>
    %124 = arith.addf %122, %123 : vector<8x32xf32>
    %c0_76 = arith.constant 0 : index
    %c0_77 = arith.constant 0 : index
    %125 = vector.load %arg20[%c0_76, %c0_77] : memref<8x32xf32, #tpu.memory_space<vmem>>, vector<8x32xf32>
    tpu.vector_store %arg20[%c0_76, %c0_77], %124 {strides = array<i32>} : memref<8x32xf32, #tpu.memory_space<vmem>>, vector<8x32xf32>,
    %c1_i32 = arith.constant 1 : i32
    %126 = arith.cmpi eq, %arg1, %c1_i32 : i32
    %127 = arith.extui %126 : i1 to i32
    %c0_i32_78 = arith.constant 0 : i32
    %128 = arith.cmpi ne, %127, %c0_i32_78 : i32
    scf.if %128 {
      %c0_79 = arith.constant 0 : index
      %c0_80 = arith.constant 0 : index
      %c0_81 = arith.constant 0 : index
      %129 = vector.load %arg19[%c0_79, %c0_80, %c0_81] : memref<1x8x32xf32, #tpu.memory_space<vmem>>, vector<1x8x32xf32>
      %130 = vector.shape_cast %129 : vector<1x8x32xf32> to vector<8x32xf32>
      %131 = vector.shape_cast %124 : vector<8x32xf32> to vector<1x8x32xf32>
      tpu.vector_store %arg19[%c0_79, %c0_80, %c0_81], %131 {strides = array<i32>} : memref<1x8x32xf32, #tpu.memory_space<vmem>>, vector<1x8x32xf32>,
    } else {
    }
    return
  }
  func.func @transform_0(%arg0: i32, %arg1: i32) -> (i32, i32, i32) {
    %c0_i32 = arith.constant 0 : i32
    %c0_i32_0 = arith.constant 0 : i32
    %c0_i32_1 = arith.constant 0 : i32
    return %arg0, %c0_i32, %c0_i32_0 : i32, i32, i32
  }
  func.func @transform_1(%arg0: i32, %arg1: i32) -> (i32, i32) {
    %c0_i32 = arith.constant 0 : i32
    %c0_i32_0 = arith.constant 0 : i32
    %c0_i32_1 = arith.constant 0 : i32
    return %c0_i32, %c0_i32_0 : i32, i32
  }
  func.func @transform_2(%arg0: i32, %arg1: i32) -> (i32, i32, i32) {
    %c0_i32 = arith.constant 0 : i32
    %c0_i32_0 = arith.constant 0 : i32
    %c0_i32_1 = arith.constant 0 : i32
    return %arg0, %c0_i32, %c0_i32_0 : i32, i32, i32
  }
  func.func @transform_3(%arg0: i32, %arg1: i32) -> (i32, i32, i32, i32) {
    %c0_i32 = arith.constant 0 : i32
    %c0_i32_0 = arith.constant 0 : i32
    %c0_i32_1 = arith.constant 0 : i32
    %c0_i32_2 = arith.constant 0 : i32
    return %arg1, %c0_i32, %c0_i32_0, %c0_i32_1 : i32, i32, i32, i32
  }
  func.func @transform_4(%arg0: i32, %arg1: i32) -> (i32, i32, i32, i32) {
    %c0_i32 = arith.constant 0 : i32
    %c0_i32_0 = arith.constant 0 : i32
    %c0_i32_1 = arith.constant 0 : i32
    %c0_i32_2 = arith.constant 0 : i32
    return %arg1, %c0_i32, %c0_i32_0, %c0_i32_1 : i32, i32, i32, i32
  }
  func.func @transform_5(%arg0: i32, %arg1: i32) -> (i32, i32, i32, i32) {
    %c0_i32 = arith.constant 0 : i32
    %c0_i32_0 = arith.constant 0 : i32
    %c0_i32_1 = arith.constant 0 : i32
    %c0_i32_2 = arith.constant 0 : i32
    return %arg1, %c0_i32, %c0_i32_0, %c0_i32_1 : i32, i32, i32, i32
  }
  func.func @transform_6(%arg0: i32, %arg1: i32) -> (i32, i32, i32, i32) {
    %c0_i32 = arith.constant 0 : i32
    %c0_i32_0 = arith.constant 0 : i32
    %c0_i32_1 = arith.constant 0 : i32
    %c0_i32_2 = arith.constant 0 : i32
    return %arg1, %c0_i32, %c0_i32_0, %c0_i32_1 : i32, i32, i32, i32
  }
  func.func @transform_7(%arg0: i32, %arg1: i32) -> (i32, i32, i32, i32) {
    %c0_i32 = arith.constant 0 : i32
    %c0_i32_0 = arith.constant 0 : i32
    %c0_i32_1 = arith.constant 0 : i32
    %c0_i32_2 = arith.constant 0 : i32
    return %arg1, %c0_i32, %c0_i32_0, %c0_i32_1 : i32, i32, i32, i32
  }
  func.func @transform_8(%arg0: i32, %arg1: i32) -> (i32, i32, i32, i32) {
    %c0_i32 = arith.constant 0 : i32
    %c0_i32_0 = arith.constant 0 : i32
    %c0_i32_1 = arith.constant 0 : i32
    %c0_i32_2 = arith.constant 0 : i32
    return %arg1, %c0_i32, %c0_i32_0, %c0_i32_1 : i32, i32, i32, i32
  }
  func.func @transform_9(%arg0: i32, %arg1: i32) -> (i32, i32, i32, i32) {
    %c0_i32 = arith.constant 0 : i32
    %c0_i32_0 = arith.constant 0 : i32
    %c0_i32_1 = arith.constant 0 : i32
    %c0_i32_2 = arith.constant 0 : i32
    return %arg1, %c0_i32, %c0_i32_0, %c0_i32_1 : i32, i32, i32, i32
  }
  func.func @transform_10(%arg0: i32, %arg1: i32) -> (i32, i32, i32) {
    %c0_i32 = arith.constant 0 : i32
    %c0_i32_0 = arith.constant 0 : i32
    %c0_i32_1 = arith.constant 0 : i32
    return %arg1, %c0_i32, %c0_i32_0 : i32, i32, i32
  }
  func.func @transform_11(%arg0: i32, %arg1: i32) -> (i32, i32, i32) {
    %c0_i32 = arith.constant 0 : i32
    %c0_i32_0 = arith.constant 0 : i32
    %c0_i32_1 = arith.constant 0 : i32
    return %arg1, %c0_i32, %c0_i32_0 : i32, i32, i32
  }
  func.func @transform_12(%arg0: i32, %arg1: i32) -> (i32, i32, i32) {
    %c0_i32 = arith.constant 0 : i32
    %c0_i32_0 = arith.constant 0 : i32
    %c0_i32_1 = arith.constant 0 : i32
    return %arg1, %c0_i32, %c0_i32_0 : i32, i32, i32
  }
  func.func @transform_13(%arg0: i32, %arg1: i32) -> (i32, i32, i32) {
    %c0_i32 = arith.constant 0 : i32
    %c0_i32_0 = arith.constant 0 : i32
    %c0_i32_1 = arith.constant 0 : i32
    return %arg1, %c0_i32, %c0_i32_0 : i32, i32, i32
  }
  func.func @transform_14(%arg0: i32, %arg1: i32) -> (i32, i32, i32) {
    %c0_i32 = arith.constant 0 : i32
    %c0_i32_0 = arith.constant 0 : i32
    %c0_i32_1 = arith.constant 0 : i32
    return %arg1, %c0_i32, %c0_i32_0 : i32, i32, i32
  }
  func.func @transform_15(%arg0: i32, %arg1: i32) -> (i32, i32, i32) {
    %c0_i32 = arith.constant 0 : i32
    %c0_i32_0 = arith.constant 0 : i32
    %c0_i32_1 = arith.constant 0 : i32
    return %arg1, %c0_i32, %c0_i32_0 : i32, i32, i32
  }
  func.func @transform_16(%arg0: i32, %arg1: i32) -> (i32, i32, i32) {
    %c0_i32 = arith.constant 0 : i32
    %c0_i32_0 = arith.constant 0 : i32
    %c0_i32_1 = arith.constant 0 : i32
    return %arg1, %c0_i32, %c0_i32_0 : i32, i32, i32
  }
  func.func @transform_17(%arg0: i32, %arg1: i32) -> (i32, i32, i32) {
    %c0_i32 = arith.constant 0 : i32
    %c0_i32_0 = arith.constant 0 : i32
    %c0_i32_1 = arith.constant 0 : i32
    return %arg0, %c0_i32, %c0_i32_0 : i32, i32, i32
  }
}

</mosaic_0001>

<bundles_post_ra>
// kernel: tpu_custom_call.1
= control target key start
LH: loop header
LB: loop body
LE: loop exit
PB: predicated region body
PF: predicated region fallthrough
CT: control target
= control target key end

     0   :  { %s4504_s0 = inlined_call_operand.vmem [shape: f32[2,8,32], index: 0, kind: input, shape index: {}]   ;;  %s4505_s1 = inlined_call_operand.vmem [shape: f32[8,32], index: 1, kind: input, shape index: {}]   ;;  %s4506_s2 = inlined_call_operand.vmem [shape: f32[2,1,8], index: 2, kind: input, shape index: {}]   ;;  %s4507_s3 = inlined_call_operand.vmem [shape: f32[2,4,32,8], index: 3, kind: input, shape index: {}]   ;;  %s4508_s4 = inlined_call_operand.vmem [shape: f32[2,4,1,8], index: 4, kind: input, shape index: {}]   ;;  %s4509_s5 = inlined_call_operand.vmem [shape: f32[2,4,32,8], index: 5, kind: input, shape index: {}]   ;;  %s4510_s6 = inlined_call_operand.vmem [shape: f32[2,4,1,8], index: 6, kind: input, shape index: {}]   ;;  %s4511_s7 = inlined_call_operand.vmem [shape: f32[2,4,32,8], index: 7, kind: input, shape index: {}]   ;;  %s4512_s8 = inlined_call_operand.vmem [shape: f32[2,4,1,8], index: 8, kind: input, shape index: {}]   ;;  %s4513_s9 = inlined_call_operand.vmem [shape: f32[2,4,8,32], index: 9, kind: input, shape index: {}]   ;;  %s4514_s10 = inlined_call_operand.vmem [shape: f32[2,1,32], index: 10, kind: input, shape index: {}]   ;;  %s4515_s11 = inlined_call_operand.vmem [shape: f32[2,1,32], index: 11, kind: input, shape index: {}]   ;;  %s4516_s12 = inlined_call_operand.vmem [shape: f32[2,1,32], index: 12, kind: input, shape index: {}]   ;;  %s4517_s13 = inlined_call_operand.vmem [shape: f32[2,32,64], index: 13, kind: input, shape index: {}]   ;;  %s4518_s14 = inlined_call_operand.vmem [shape: f32[2,1,64], index: 14, kind: input, shape index: {}]   ;;  %s4519_s15 = inlined_call_operand.vmem [shape: f32[2,64,32], index: 15, kind: input, shape index: {}]   ;;  %s4520_s16 = inlined_call_operand.vmem [shape: f32[2,1,32], index: 16, kind: input, shape index: {}]   ;;  %s4521_s17 = inlined_call_operand.hbm [shape: f32[2,8,32], index: 17, kind: output, shape index: {}]  }
   0x1   :  { %4539 = sst [smem:[#allocation21_spill]] %s4504_s0 }
   0x2   :  { %4540 = sst [smem:[#allocation22_spill]] %s4505_s1 }
   0x3   :  { %4541 = sst [smem:[#allocation23_spill]] %s4506_s2 }
   0x4   :  { %4542 = sst [smem:[#allocation24_spill]] %s4507_s3 }
   0x5   :  { %4543 = sst [smem:[#allocation25_spill]] %s4508_s4 }
   0x6   :  { %4544 = sst [smem:[#allocation26_spill]] %s4509_s5 }
   0x7   :  { %4545 = sst [smem:[#allocation27_spill]] %s4510_s6 }
   0x8   :  { %4546 = sst [smem:[#allocation28_spill]] %s4511_s7 }
   0x9   :  { %4547 = sst [smem:[#allocation29_spill]] %s4512_s8 }
   0xa   :  { %4548 = sst [smem:[#allocation30_spill]] %s4513_s9 }
   0xb   :  { %4549 = sst [smem:[#allocation31_spill]] %s4514_s10 }
   0xc   :  { %4550 = sst [smem:[#allocation32_spill]] %s4515_s11 }
   0xd   :  { %4551 = sst [smem:[#allocation33_spill]] %s4519_s15 }
   0xe   :  { %4552 = sst [smem:[#allocation34_spill]] %s4520_s16 }
   0xf   :  { %4553 = sst [smem:[#allocation35_spill]] %s4521_s17 }
  0x10   :  { %22 = vsyncpa [#allocation4], 0 }
  0x11   :  { %24 = vsyncpa [#allocation4 + $0x1], 0  ;;  %s4014_s24 = smov 0   ;;  %s4016_s25 = smov 0  }
  0x12   :  { %s4018_s26 = smov 0   ;;  %s4020_s27 = smov 0  }
  0x13   :  { %s4022_s28 = smov 0   ;;  %s4024_s29 = smov 0  }
  0x14   :  { %s4026_s0 = smov 0   ;;  %s4028_s30 = smov 0  }
  0x15 LB: > { %4554 = sst [smem:[#allocation6_spill]] %s3890_s24  ;;  %s3238_s18 = sadd.s32 4294967295, %s3918_s30   ;;  %s3918_s30 = sphi %s4028_s30, %s30_s30   ;;  %s3914_s0 = sphi %s4026_s0, %s4611_s0   ;;  %s3910_s29 = sphi %s4024_s29, %s4610_s29   ;;  %s3906_s28 = sphi %s4022_s28, %s4609_s28   ;;  %s3902_s27 = sphi %s4020_s27, %s4608_s27   ;;  %s3898_s26 = sphi %s4018_s26, %s4607_s26   ;;  %s3894_s25 = sphi %s4016_s25, %s4606_s25   ;;  %s3890_s24 = sphi %s4014_s24, %s4605_s24  }
  0x16   : > { %4555 = sst [smem:[#allocation7_spill]] %s3894_s25  ;;  %s3239_s19 = sadd.s32 4294967294, %s3918_s30  }
  0x17   : > { %4556 = sst [smem:[#allocation8_spill]] %s3898_s26  ;;  %s39_s1 = sadd.s32 1, %s3910_s29 }
  0x18   : > { %4557 = sst [smem:[#allocation9_spill]] %s3902_s27  ;;  %p40_p0 = scmp.ge.s32.totalorder %s39_s1, 2 }
  0x19   : > { %4558 = sst [smem:[#allocation10_spill]] %s3906_s28  ;;  %s42_s20 = sadd.s32 1, %s3914_s0 }
  0x1a   : > { %4559 = sst [smem:[#allocation11_spill]] %s3910_s29  ;;  %p496_p1 = scmp.ne.s32.totalorder %s3898_s26, %s3894_s25 }
  0x1b   : > { %4560 = sst [smem:[#allocation12_spill]] %s3914_s0  ;;  %p497_p2 = scmp.eq.s32.totalorder %s3238_s18, 3 }
  0x1c   : > { %4561 = sst [smem:[#allocation13_spill]] %s3918_s30  ;;  %s4613_s1 = smov (%p40_p0, %s39_s1), 0 }
  0x1d   : > { %4562 = sst [smem:[#allocation14_spill]] %s4613_s1  ;;  %s4615_s20 = smov (!%p40_p0, %s42_s20), %s3914_s0 }
  0x1e   : > { %p4063_p3 = por %p497_p2, %p496_p1  ;;  %p502_p4 = scmp.ne.s32.totalorder %s3894_s25, %s3890_s24 }
  0x1f   : > { %p44_p5 = scmp.ge.s32.totalorder %s4615_s20, 2  ;;  %p503_p6 = scmp.eq.s32.totalorder %s3239_s19, 3 }
  0x20   : > { %s4563_s21 = scalar_select %p4063_p3, 1, 0 }
  0x21   : > { %p3242_p7 = scmp.ge.s32.totalorder %s3918_s30, 1  ;;  %p636_p8 = scmp.lt.s32.totalorder %s3918_s30, 5 }
  0x22   : > { %4564 = sst [smem:[#allocation15_spill]] %s4563_s21  ;;  %s4617_s20 = smov (%p44_p5, %s4615_s20), 0 }
  0x23   : > { %4565 = sst [smem:[#allocation16_spill]] %s4617_s20  ;;  %p4073_p9 = por %p503_p6, %p502_p4 }
  0x24   : > { %p637_p10 = pnand %p3242_p7, %p636_p8  ;;  %s483_s23 = ssub.s32 %s3914_s0, %s4617_s20 }
  0x25   : > { %s4566_s22 = scalar_select %p4073_p9, 1, 0 }
  0x26   : > { %s486_s18 = sadd.s32 1, %s3898_s26  ;;  %p484_p11 = scmp.eq.s32.totalorder %s483_s23, 0 }
  0x27   : > { %4567 = sst [smem:[#allocation17_spill]] %s4566_s22  ;;  %640 = sbr.rel (%p637_p10) target bundleno = 2377 (0x949), region = 88 }
  0x28   : > { %s4081_s1 = scalar_select %p484_p11, %s3898_s26, %s486_s18  }
  0x2a   : > { %4568 = sst [smem:[#allocation18_spill]] %s4081_s1 }
  0x2e   : > { %s4526_s19 = sand.u32 1, %s3894_s25   ;;  %p747_p12 = scmp.lt.s32.totalorder %s3906_s28, 1 }
  0x2f   : > { %s4087_s29 = sshll.u32 %s4526_s19, 3  ;;  %p754_p13 = scmp.lt.s32.totalorder %s3902_s27, 1 }
  0x30   : > { %s4091_s22 = scalar_select %p747_p12, %s3906_s28, 1 }
  0x31   : > { %s4094_s23 = scalar_select %p754_p13, %s3902_s27, 1 }
  0x32   : > { %4569 = sst [smem:[#allocation19_spill]] %s4091_s22  ;;  %s3244_s18 = sshll.u32 %s4091_s22, 3 }
  0x33   : > { %s4571_s24 = sld [smem:[#allocation21_spill]]  ;;  %s3314_s17 = sshll.u32 %s4094_s23, 7 }
  0x34   : > { %s4572_s3 = sld [smem:[#allocation24_spill]]  ;;  %s3247_s27 = sshll.u32 %s4094_s23, 2 }
  0x35   : > { %s4573_s4 = sld [smem:[#allocation25_spill]]  ;;  %s4575_s5 = sld [smem:[#allocation26_spill]] }
  0x36   : > { %s4576_s6 = sld [smem:[#allocation27_spill]]  ;;  %s4577_s7 = sld [smem:[#allocation28_spill]] }
  0x37   : > { %s4578_s8 = sld [smem:[#allocation29_spill]]  ;;  %s4579_s9 = sld [smem:[#allocation30_spill]] }
  0x38   : > { %s794_s2 = scalar_lea.vmem %s4516_s12, %s4094_s23  ;;  %s4582_s19 = sld [smem:[#allocation34_spill]] }
  0x39   : > { %s750_s30 = scalar_lea.vmem %s4571_s24, %s3244_s18  ;;  %s746_s25 = scalar_lea.vmem [#allocation3], %s4087_s29 }
  0x3a   : > { %s4108_s28 = scalar_lea.vmem %s4572_s3, %s3314_s17  ;;  %s4584_s21 = sld [smem:[#allocation9_spill]] }
  0x3b   : > { %s4114_s0 = scalar_lea.vmem %s4573_s4, %s3247_s27  ;;  %s4119_s26 = scalar_lea.vmem %s4575_s5, %s3314_s17 }
  0x3c   : > { %4574 = sst [smem:[#allocation20_spill]] %s4114_s0  ;;  %s4124_s18 = scalar_lea.vmem %s4576_s6, %s3247_s27 }
  0x3d   : > { %s4129_s3 = scalar_lea.vmem %s4577_s7, %s3314_s17  ;;  %s4134_s16 = scalar_lea.vmem %s4578_s8, %s3247_s27 }
  0x3e   : > { %s3317_s4 = sshll.u32 %s4094_s23, 5  ;;  %s802_s8 = scalar_lea.vmem %s4518_s14, %s4094_s23 }
  0x3f   : > { %s4140_s20 = scalar_lea.vmem %s4579_s9, %s3317_s4  ;;  %s4157_s7 = scalar_lea.vmem %s4517_s13, %s3317_s4 }
  0x40   : > { %s3319_s9 = sshll.u32 %s4094_s23, 6  ;;  %s810_s10 = scalar_lea.vmem %s4582_s19, %s4094_s23 }
  0x41   : > { %s4583_s17 = sld [smem:[#allocation33_spill]]  ;;  %p3260_p0 = scmp.ne.s32.totalorder %s4584_s21, 0 }
  0x42   : > { %v815_v0 = vld [vmem:[%s750_s30] sm:$0xff] (!%p3260_p0)  ;;  %s4585_s15 = sld [smem:[#allocation22_spill]] (!%p3260_p0)  ;;  %vm819_vm0 = vcmask (!%p3260_p0), 261120  }
  0x43   : > { %814 = sbr.rel (%p3260_p0) target bundleno = 76 (0x4c), region = 92  ;;  %v816_v2 = vmul.f32 (!%p3260_p0), 5.656854, %v815_v0 }
  0x47   : > { %s4171_s11 = scalar_lea.vmem %s4583_s17, %s3319_s9 }
  0x48   : > { %v817_v1 = vld [vmem:[%s4585_s15] sm:$0xff] (!%p3260_p0) }
  0x49   : > { %v818_v3 = vadd.f32 (!%p3260_p0), %v817_v1, %v816_v2 }
  0x4b   : > { %820 = vst.msk [vmem:[#allocation2] sm:$0xff] %vm819_vm0, %v818_v3 }
  0x4c PF: > { %v823_v4 = vld [vmem:[%s4108_s28] sm:$0xff]  ;;  %v824_v5 = vld [vmem:[%s4108_s28 + $0x8] sm:$0xff]  ;;  %v3920_v7 = vmov 0.0|0.0   ;;  %v825_v10 = vld [vmem:[%s4108_s28 + $0x10] sm:$0xff]  ;;  %vm3921_vm1 = vmmov 0   ;;  %v3922_v15 = vmov 0.0  }
  0x4d   : > { %v827_v6 = vld [vmem:[%s4108_s28 + $0x20] sm:$0xff]  ;;  %3640 = vmatprep.subr.bf16.mxu0 %v3920_v7  ;;  %3646 = vmatprep.subr.bf16.mxu1 %v3920_v7  ;;  %v3641_v8 = vpack.c.bf16 %v824_v5, %v823_v4  ;;  %v828_v9 = vld [vmem:[%s4108_s28 + $0x28] sm:$0xff]  ;;  %v826_v11 = vld [vmem:[%s4108_s28 + $0x18] sm:$0xff]  ;;  %vm914_vm2 = vcmask 261120   ;;  %s4586_s9 = sld [smem:[#allocation20_spill]]  ;;  %vm1806_vm3 = vcmask 64512  }
  0x4e   : > { %v3647_v12 = vpack.c.bf16 %v828_v9, %v827_v6  ;;  %v829_v13 = vld [vmem:[%s4108_s28 + $0x30] sm:$0xff]  ;;  %v830_v14 = vld [vmem:[%s4108_s28 + $0x38] sm:$0xff]  ;;  %3426 = vmatprep.mubr.msk.f32.mxu0 %vm3921_vm1, %v3922_v15  ;;  %3437 = vmatprep.mubr.msk.f32.mxu1 %vm3921_vm1, %v3922_v15  ;;  %v3644_v16 = vpack.c.bf16 %v826_v11, %v825_v10  ;;  %v831_v18 = vld [vmem:[%s4108_s28 + $0x40] sm:$0xff]  ;;  %s4590_s19 = sld [smem:[#allocation31_spill]]  ;;  %s4592_s1 = sld [smem:[#allocation32_spill]]  ;;  %vm2896_vm4 = vcmask 523264  }
  0x4f   : > { %3642 = vmatpush3.bf16.msra.mxu0 %v3641_v8  ;;  %v3650_v17 = vpack.c.bf16 %v830_v14, %v829_v13  ;;  %v832_v19 = vld [vmem:[%s4108_s28 + $0x48] sm:$0xff]  ;;  %v835_v20 = vld [vmem:[%s4108_s28 + $0x60] sm:$0xff]  ;;  %v833_v25 = vld [vmem:[%s4108_s28 + $0x50] sm:$0xff] }
  0x50   : > { %3648 = vmatpush3.bf16.msra.mxu1 %v3647_v12  ;;  %3643 = vmatprep.subr.bf16.mxu0 %v3920_v7  ;;  %v836_v21 = vld [vmem:[%s4108_s28 + $0x68] sm:$0xff]  ;;  %v3653_v23 = vpack.c.bf16 %v832_v19, %v831_v18  ;;  %v834_v26 = vld [vmem:[%s4108_s28 + $0x58] sm:$0xff]  ;;  %v837_v27 = vld [vmem:[%s4108_s28 + $0x70] sm:$0xff] }
  0x51   : > { %3649 = vmatprep.subr.bf16.mxu1 %v3920_v7  ;;  %v3659_v24 = vpack.c.bf16 %v836_v21, %v835_v20  ;;  %v838_v28 = vld [vmem:[%s4108_s28 + $0x78] sm:$0xff]  ;;  %v3656_v29 = vpack.c.bf16 %v834_v26, %v833_v25  ;;  %v839_v31 = vld [vmem:[%s4119_s26] sm:$0xff]  ;;  %v840_v32 = vld [vmem:[%s4119_s26 + $0x8] sm:$0xff] }
  0x52   : > { %v4198_v22 = vld [vmem:[#allocation2] sm:$0xff]  ;;  %v3662_v30 = vpack.c.bf16 %v838_v28, %v837_v27  ;;  %v844_v34 = vld [vmem:[%s4119_s26 + $0x28] sm:$0xff]  ;;  %v3665_v35 = vpack.c.bf16 %v840_v32, %v839_v31  ;;  %v841_v37 = vld [vmem:[%s4119_s26 + $0x10] sm:$0xff] }
  0x53   : > { %3645 = vmatpush3.bf16.msra.mxu0 %v3644_v16  ;;  %v843_v33 = vld [vmem:[%s4119_s26 + $0x20] sm:$0xff]  ;;  %v842_v38 = vld [vmem:[%s4119_s26 + $0x18] sm:$0xff]  ;;  %v845_v39 = vld [vmem:[%s4119_s26 + $0x30] sm:$0xff] }
  0x54   : > { %3651 = vmatpush3.bf16.msra.mxu1 %v3650_v17  ;;  %3652 = vmatprep.subr.bf16.mxu0 %v3920_v7  ;;  %v3671_v36 = vpack.c.bf16 %v844_v34, %v843_v33  ;;  %v846_v40 = vld [vmem:[%s4119_s26 + $0x38] sm:$0xff]  ;;  %v3668_v41 = vpack.c.bf16 %v842_v38, %v841_v37  ;;  %v847_v43 = vld [vmem:[%s4119_s26 + $0x40] sm:$0xff]  ;;  %v848_v44 = vld [vmem:[%s4119_s26 + $0x48] sm:$0xff]  ;;  %s4591_s17 = scalar_lea.vmem %s4590_s19, %s4094_s23  ;;  %s4593_s5 = scalar_lea.vmem %s4592_s1, %s4094_s23 }
  0x55   : > { %3658 = vmatprep.subr.bf16.mxu1 %v3920_v7  ;;  %v3674_v42 = vpack.c.bf16 %v846_v40, %v845_v39  ;;  %v851_v45 = vld [vmem:[%s4119_s26 + $0x60] sm:$0xff]  ;;  %v852_v46 = vld [vmem:[%s4119_s26 + $0x68] sm:$0xff]  ;;  %v3677_v47 = vpack.c.bf16 %v848_v44, %v847_v43  ;;  %v849_v49 = vld [vmem:[%s4119_s26 + $0x50] sm:$0xff] }
  0x56   : > { %3427 = vmatmul.mubr.msk.f32.vlgmr.msra.gmra.mrb[0].mxu0 %vm914_vm2, %v4198_v22  ;;  %v3683_v48 = vpack.c.bf16 %v852_v46, %v851_v45  ;;  %v850_v50 = vld [vmem:[%s4119_s26 + $0x58] sm:$0xff]  ;;  %v853_v51 = vld [vmem:[%s4119_s26 + $0x70] sm:$0xff]  ;;  %v855_v55 = vld [vmem:[%s4129_s3] sm:$0xff] }
  0x57   : > { %3438 = vmatmul.mubr.msk.f32.vlgmr.msra.gmra.mrb[0].mxu1 %vm914_vm2, %v4198_v22  ;;  %3654 = vmatpush3.bf16.msra.mxu0 %v3653_v23  ;;  %v854_v52 = vld [vmem:[%s4119_s26 + $0x78] sm:$0xff]  ;;  %v3680_v53 = vpack.c.bf16 %v850_v50, %v849_v49  ;;  %v856_v56 = vld [vmem:[%s4129_s3 + $0x8] sm:$0xff]  ;;  %v857_v58 = vld [vmem:[%s4129_s3 + $0x10] sm:$0xff]  ;;  %s4588_s26 = sld [smem:[#allocation23_spill]] }
  0x58   : > { %3660 = vmatpush3.bf16.msra.mxu1 %v3659_v24  ;;  %3655 = vmatprep.subr.bf16.mxu0 %v3920_v7  ;;  %v3686_v54 = vpack.c.bf16 %v854_v52, %v853_v51  ;;  %v3689_v57 = vpack.c.bf16 %v856_v56, %v855_v55  ;;  %v858_v59 = vld [vmem:[%s4129_s3 + $0x18] sm:$0xff]  ;;  %v859_v61 = vld [vmem:[%s4129_s3 + $0x20] sm:$0xff]  ;;  %v860_v62 = vld [vmem:[%s4129_s3 + $0x28] sm:$0xff] }
  0x59   : > { %3661 = vmatprep.subr.bf16.mxu1 %v3920_v7  ;;  %3448 = vmatprep.mubr.msk.f32.mxu0 %vm3921_vm1, %v3922_v15  ;;  %v3692_v60 = vpack.c.bf16 %v858_v59, %v857_v58  ;;  %v863_v63 = vld [vmem:[%s4129_s3 + $0x40] sm:$0xff]  ;;  %v3695_v0 = vpack.c.bf16 %v860_v62, %v859_v61  ;;  %v864_v1 = vld [vmem:[%s4129_s3 + $0x48] sm:$0xff]  ;;  %v861_v3 = vld [vmem:[%s4129_s3 + $0x30] sm:$0xff] }
  0x5a   : > { %3459 = vmatprep.mubr.msk.f32.mxu1 %vm3921_vm1, %v3922_v15  ;;  %v3701_v2 = vpack.c.bf16 %v864_v1, %v863_v63  ;;  %v862_v4 = vld [vmem:[%s4129_s3 + $0x38] sm:$0xff]  ;;  %v865_v5 = vld [vmem:[%s4129_s3 + $0x50] sm:$0xff]  ;;  %v867_v10 = vld [vmem:[%s4129_s3 + $0x60] sm:$0xff] }
  0x5b   : > { %3657 = vmatpush3.bf16.msra.mxu0 %v3656_v29  ;;  %v3698_v6 = vpack.c.bf16 %v862_v4, %v861_v3  ;;  %v866_v8 = vld [vmem:[%s4129_s3 + $0x58] sm:$0xff]  ;;  %v868_v11 = vld [vmem:[%s4129_s3 + $0x68] sm:$0xff]  ;;  %v869_v13 = vld [vmem:[%s4129_s3 + $0x70] sm:$0xff] }
  0x5c   : > { %3663 = vmatpush3.bf16.msra.mxu1 %v3662_v30  ;;  %3664 = vmatprep.subr.bf16.mxu0 %v3920_v7  ;;  %v3704_v9 = vpack.c.bf16 %v866_v8, %v865_v5  ;;  %v3707_v12 = vpack.c.bf16 %v868_v11, %v867_v10  ;;  %v870_v14 = vld [vmem:[%s4129_s3 + $0x78] sm:$0xff]  ;;  %v3269_v26 = vld [vmem:[%s4124_s18] ss:$0 sm:$0xff]  ;;  %v3270_v28 = vld [vmem:[%s4124_s18 + $0x1] ss:$0 sm:$0xff]  ;;  %s4587_s3 = sld [smem:[#allocation19_spill]] }
  0x5d   : > { %3670 = vmatprep.subr.bf16.mxu1 %v3920_v7  ;;  %v3710_v16 = vpack.c.bf16 %v870_v14, %v869_v13  ;;  %v3261_v29 = vld [vmem:[%s4586_s9] ss:$0 sm:$0xff]  ;;  %v3271_v37 = vld [vmem:[%s4124_s18 + $0x2] ss:$0 sm:$0xff]  ;;  %v3272_v38 = vld [vmem:[%s4124_s18 + $0x3] ss:$0 sm:$0xff] }
  0x5e   : > { %3449 = vmatmul.mubr.msk.f32.vlgmr.msra.gmra.mrb[2].mxu0 %vm914_vm2, %v4198_v22  ;;  %v3264_v45 = vld [vmem:[%s4586_s9 + $0x3] ss:$0 sm:$0xff]  ;;  %v3277_v50 = vld [vmem:[%s4134_s16] ss:$0 sm:$0xff] }
  0x5f   : > { %3460 = vmatmul.mubr.msk.f32.vlgmr.msra.gmra.mrb[2].mxu1 %vm914_vm2, %v4198_v22  ;;  %3666 = vmatpush3.bf16.msra.mxu0 %v3665_v35 }
  0x60   : > { %3672 = vmatpush3.bf16.msra.mxu1 %v3671_v36  ;;  %3667 = vmatprep.subr.bf16.mxu0 %v3920_v7  ;;  %v3262_v36 = vld [vmem:[%s4586_s9 + $0x1] ss:$0 sm:$0xff] }
  0x61   : > { %3673 = vmatprep.subr.bf16.mxu1 %v3920_v7  ;;  %3470 = vmatprep.mubr.msk.f32.mxu0 %vm3921_vm1, %v3922_v15 }
  0x62   : > { %3481 = vmatprep.mubr.msk.f32.mxu1 %vm3921_vm1, %v3922_v15  ;;  %s4589_s18 = scalar_lea.vmem %s4588_s26, %s4587_s3 }
  0x63   : > { %3669 = vmatpush3.bf16.msra.mxu0 %v3668_v41  ;;  %v3263_v41 = vld [vmem:[%s4586_s9 + $0x2] ss:$0 sm:$0xff]  ;;  %v3293_v63 = vld [vmem:[%s4589_s18] ss:$0 sm:$0xff] }
  0x64   : > { %3675 = vmatpush3.bf16.msra.mxu1 %v3674_v42  ;;  %3676 = vmatprep.subr.bf16.mxu0 %v3920_v7 }
  0x65   : > { %3682 = vmatprep.subr.bf16.mxu1 %v3920_v7 }
  0x66   : > { %3471 = vmatmul.mubr.msk.f32.vlgmr.msra.gmra.mrb[4].mxu0 %vm914_vm2, %v4198_v22 }
  0x67   : > { %3482 = vmatmul.mubr.msk.f32.vlgmr.msra.gmra.mrb[4].mxu1 %vm914_vm2, %v4198_v22  ;;  %3678 = vmatpush3.bf16.msra.mxu0 %v3677_v47 }
  0x68   : > { %3684 = vmatpush3.bf16.msra.mxu1 %v3683_v48  ;;  %3679 = vmatprep.subr.bf16.mxu0 %v3920_v7 }
  0x69   : > { %3685 = vmatprep.subr.bf16.mxu1 %v3920_v7  ;;  %3492 = vmatprep.mubr.msk.f32.mxu0 %vm3921_vm1, %v3922_v15 }
  0x6a   : > { %3503 = vmatprep.mubr.msk.f32.mxu1 %vm3921_vm1, %v3922_v15 }
  0x6b   : > { %3681 = vmatpush3.bf16.msra.mxu0 %v3680_v53 }
  0x6c   : > { %3687 = vmatpush3.bf16.msra.mxu1 %v3686_v54  ;;  %3688 = vmatprep.subr.bf16.mxu0 %v3920_v7  ;;  %v3278_v54 = vld [vmem:[%s4134_s16 + $0x1] ss:$0 sm:$0xff] }
  0x6d   : > { %3694 = vmatprep.subr.bf16.mxu1 %v3920_v7 }
  0x6e   : > { %3493 = vmatmul.mubr.msk.f32.vlgmr.msra.gmra.mrb[6].mxu0 %vm914_vm2, %v4198_v22 }
  0x6f   : > { %3504 = vmatmul.mubr.msk.f32.vlgmr.msra.gmra.mrb[6].mxu1 %vm914_vm2, %v4198_v22  ;;  %3690 = vmatpush3.bf16.msra.mxu0 %v3689_v57 }
  0x70   : > { %3691 = vmatprep.subr.bf16.mxu0 %v3920_v7  ;;  %3514 = vmatprep.mubr.msk.f32.mxu0 %vm3921_vm1, %v3922_v15 }
  0x71   : > { %3525 = vmatprep.mubr.msk.f32.mxu1 %vm3921_vm1, %v3922_v15  ;;  %3696 = vmatpush3.bf16.msra.mxu1 %v3695_v0 }
  0x72   : > { %3697 = vmatprep.subr.bf16.mxu1 %v3920_v7 }
  0x73   : > { %3693 = vmatpush3.bf16.msra.mxu0 %v3692_v60 }
  0x74   : > { %3700 = vmatprep.subr.bf16.mxu0 %v3920_v7 }
  0x75   : > { %3699 = vmatpush3.bf16.msra.mxu1 %v3698_v6 }
  0x76   : > { %3515 = vmatmul.mubr.msk.f32.vlgmr.msra.gmra.mrb[8].mxu0 %vm914_vm2, %v4198_v22  ;;  %3706 = vmatprep.subr.bf16.mxu1 %v3920_v7 }
  0x77   : > { %3702 = vmatpush3.bf16.msra.mxu0 %v3701_v2  ;;  %3536 = vmatprep.mubr.msk.f32.mxu0 %vm3921_vm1, %v3922_v15 }
  0x78   : > { %3703 = vmatprep.subr.bf16.mxu0 %v3920_v7  ;;  %3526 = vmatmul.mubr.msk.f32.vlgmr.msra.gmra.mrb[8].mxu1 %vm914_vm2, %v4198_v22 }
  0x79   : > { %3708 = vmatpush3.bf16.msra.mxu1 %v3707_v12  ;;  %3547 = vmatprep.mubr.msk.f32.mxu1 %vm3921_vm1, %v3922_v15 }
  0x7a   : > { %3709 = vmatprep.subr.bf16.mxu1 %v3920_v7 }
  0x7b   : > { %3705 = vmatpush3.bf16.msra.mxu0 %v3704_v9 }
  0x7c   : > { %3550 = vmatprep.subr.mxu0 %v3922_v15 }
  0x7d   : > { %3711 = vmatpush3.bf16.msra.mxu1 %v3710_v16 }
  0x7e   : > { %3537 = vmatmul.mubr.msk.f32.vlgmr.msra.gmra.mrb[10].mxu0 %vm914_vm2, %v4198_v22  ;;  %3565 = vmatprep.subr.mxu1 %v3922_v15 }
  0x7f   : > { %3552 = vmatprep.mubr.msk.f32.mxu0 %vm3921_vm1, %v3922_v15 }
  0x80   : > { %3548 = vmatmul.mubr.msk.f32.vlgmr.msra.gmra.mrb[10].mxu1 %vm914_vm2, %v4198_v22 }
  0x81   : > { %3567 = vmatprep.mubr.msk.f32.mxu1 %vm3921_vm1, %v3922_v15 }
 0x129   : > { %v984_v17 = vpop.f32.mrb[0].mxu0 }
 0x12a   : > { %v3428_v18 = vpop.f32.mrb[1].mxu0  ;;  %v1054_v19 = vpop.f32.mrb[0].mxu1  ;;  %v985_v35 = vadd.f32 %v3261_v29, %v984_v17 }
 0x12b   : > { %v3439_v20 = vpop.f32.mrb[1].mxu1  ;;  %v1055_v39 = vadd.f32 %v3262_v36, %v1054_v19 }
 0x131   : > { %v1124_v21 = vpop.f32.mrb[2].mxu0 }
 0x132   : > { %v3450_v23 = vpop.f32.mrb[3].mxu0  ;;  %v1194_v24 = vpop.f32.mrb[2].mxu1  ;;  %v1125_v48 = vadd.f32 %v3263_v41, %v1124_v21 }
 0x133   : > { %v3461_v25 = vpop.f32.mrb[3].mxu1  ;;  %v1195_v49 = vadd.f32 %v3264_v45, %v1194_v24  ;;  %v3279_v45 = vld [vmem:[%s4134_s16 + $0x2] ss:$0 sm:$0xff] }
 0x139   : > { %v1288_v27 = vpop.f32.mrb[4].mxu0 }
 0x13a   : > { %v1289_v30 = vadd.f32 %v3269_v26, %v1288_v27  ;;  %v3472_v31 = vpop.f32.mrb[5].mxu0  ;;  %v1358_v32 = vpop.f32.mrb[4].mxu1 }
 0x13b   : > { %v3483_v33 = vpop.f32.mrb[5].mxu1  ;;  %v1359_v34 = vadd.f32 %v3270_v28, %v1358_v32 }
 0x13c   : > { %3551 = vmatpush3.xpose.msk.msra.mxu0 %vm1806_vm3, %v1289_v30 }
 0x13d   : > { %3555 = vmatprep.subr.mxu0 %v3922_v15 }
 0x13f   : > { %3553 = vmatmul.mubr.msk.f32.vlgmr.msra.gmra.mrb[12].mxu0 %vm1806_vm3, %v985_v35 }
 0x140   : > { %3556 = vmatpush3.xpose.msk.msra.mxu0 %vm1806_vm3, %v1359_v34  ;;  %3557 = vmatprep.mubr.msk.f32.mxu0 %vm3921_vm1, %v3922_v15 }
 0x141   : > { %v1428_v40 = vpop.f32.mrb[6].mxu0  ;;  %3560 = vmatprep.subr.mxu0 %v3922_v15 }
 0x142   : > { %v1429_v42 = vadd.f32 %v3271_v37, %v1428_v40  ;;  %v1498_v43 = vpop.f32.mrb[6].mxu1  ;;  %v3494_v44 = vpop.f32.mrb[7].mxu0 }
 0x143   : > { %v1499_v46 = vadd.f32 %v3272_v38, %v1498_v43  ;;  %3558 = vmatmul.mubr.msk.f32.vlgmr.msra.gmra.mrb[14].mxu0 %vm1806_vm3, %v1055_v39  ;;  %v3505_v47 = vpop.f32.mrb[7].mxu1 }
 0x144   : > { %3561 = vmatpush3.xpose.msk.msra.mxu0 %vm1806_vm3, %v1429_v42  ;;  %3562 = vmatprep.mubr.msk.f32.mxu0 %vm3921_vm1, %v3922_v15 }
 0x145   : > { %3566 = vmatpush3.xpose.msk.msra.mxu1 %vm1806_vm3, %v1499_v46  ;;  %3570 = vmatprep.subr.mxu0 %v3922_v15 }
 0x146   : > { %3575 = vmatprep.subr.mxu1 %v3922_v15 }
 0x147   : > { %3563 = vmatmul.mubr.msk.f32.vlgmr.msra.gmra.mrb[16].mxu0 %vm1806_vm3, %v1125_v48 }
 0x148   : > { %3568 = vmatmul.mubr.msk.f32.vlgmr.msra.gmra.mrb[12].mxu1 %vm1806_vm3, %v1195_v49  ;;  %3572 = vmatprep.mubr.msk.f32.mxu0 %vm3921_vm1, %v3922_v15 }
 0x149   : > { %3577 = vmatprep.mubr.msk.f32.mxu1 %vm3921_vm1, %v3922_v15  ;;  %v1592_v51 = vpop.f32.mrb[8].mxu0 }
 0x14a   : > { %v1593_v52 = vadd.f32 %v3277_v50, %v1592_v51  ;;  %v3516_v53 = vpop.f32.mrb[9].mxu0  ;;  %v3280_v50 = vld [vmem:[%s4134_s16 + $0x3] ss:$0 sm:$0xff] }
 0x14b   : > { %v1662_v55 = vpop.f32.mrb[8].mxu1 }
 0x14c   : > { %3571 = vmatpush3.msra.mxu0 %v1593_v52  ;;  %v1663_v56 = vadd.f32 %v3278_v54, %v1662_v55  ;;  %v3527_v57 = vpop.f32.mrb[9].mxu1 }
 0x14d   : > { %3580 = vmatprep.subr.mxu0 %v3922_v15 }
 0x14e   : > { %3576 = vmatpush3.msra.mxu1 %v1663_v56 }
 0x14f   : > { %3585 = vmatprep.subr.mxu1 %v3922_v15 }
 0x151   : > { %v4337_v58 = vpop.f32.mrb[10].mxu0 }
 0x152   : > { %v3538_v59 = vpop.f32.mrb[11].mxu0  ;;  %v1733_v49 = vadd.f32 %v3279_v45, %v4337_v58  ;;  %v883_v58 = vld [vmem:[%s4140_s20] sm:$0xff] }
 0x153   : > { %v4340_v60 = vpop.f32.mrb[10].mxu1  ;;  %v884_v59 = vld [vmem:[%s4140_s20 + $0x8] sm:$0xff] }
 0x154   : > { %v3549_v61 = vpop.f32.mrb[11].mxu1  ;;  %v1803_v53 = vadd.f32 %v3280_v50, %v4340_v60  ;;  %v885_v60 = vld [vmem:[%s4140_s20 + $0x10] sm:$0xff]  ;;  %v3303_v50 = vld [vmem:[%s4593_s5] ss:$0 sm:$0xff] }
 0x212   : > { %v1879_v62 = vpop.f32.mrb[12].mxu0 }
 0x213   : > { %v2111_v0 = vmul.f32 0.35355338, %v1879_v62  ;;  %v3554_v1 = vpop.f32.mrb[13].mxu0 }
 0x215   : > { %v2121_v2 = vadd.f32 %v3293_v63, %v2111_v0 }
 0x216   : > { %v1955_v3 = vpop.f32.mrb[14].mxu0 }
 0x217   : > { %v2112_v4 = vmul.f32 0.35355338, %v1955_v3  ;;  %v3559_v5 = vpop.f32.mrb[15].mxu0  ;;  %v2125_v6 = vsel %vm1806_vm3, %v2121_v2, -inf }
 0x218   : > { %2126 = vmax.xlane.f32.xlu0 %v2125_v6 }
 0x219   : > { %v2122_v8 = vadd.f32 %v3293_v63, %v2112_v4 }
 0x21a   : > { %v2031_v9 = vpop.f32.mrb[16].mxu0 }
 0x21b   : > { %v2113_v10 = vmul.f32 0.35355338, %v2031_v9  ;;  %v2107_v11 = vpop.f32.mrb[12].mxu1  ;;  %v3564_v12 = vpop.f32.mrb[17].mxu0  ;;  %v2128_v13 = vsel %vm1806_vm3, %v2122_v8, -inf }
 0x21c   : > { %v2114_v14 = vmul.f32 0.35355338, %v2107_v11  ;;  %v3569_v16 = vpop.f32.mrb[13].mxu1  ;;  %2129 = vmax.xlane.f32.xlu0 %v2128_v13 }
 0x21d   : > { %v2123_v17 = vadd.f32 %v3293_v63, %v2113_v10 }
 0x21e   : > { %v2124_v19 = vadd.f32 %v3293_v63, %v2114_v14  ;;  %v886_v63 = vld [vmem:[%s4140_s20 + $0x18] sm:$0xff] }
 0x21f   : > { %v2131_v18 = vsel %vm1806_vm3, %v2123_v17, -inf }
 0x220   : > { %2132 = vmax.xlane.f32.xlu1 %v2131_v18  ;;  %v2134_v20 = vsel %vm1806_vm3, %v2124_v19, -inf }
 0x224   : > { %2135 = vmax.xlane.f32.xlu1 %v2134_v20 }
 0x2a5   : > { %v2127_v21 = vpop.xlane.xlu0 %2126 }
 0x2a6   : > { %v2137_v23 = vsub.f32 %v2121_v2, %v2127_v21 }
 0x2a8   : > { %v2141_v24 = vmul.f32 1.442695, %v2137_v23 }
 0x2a9   : > { %v2130_v25 = vpop.xlane.xlu0 %2129 }
 0x2aa   : > { %3804 = vpow2.f32 %v2141_v24  ;;  %v2138_v26 = vsub.f32 %v2122_v8, %v2130_v25 }
 0x2ac   : > { %v2143_v27 = vmul.f32 1.442695, %v2138_v26 }
 0x2ad   : > { %v2133_v28 = vpop.xlane.xlu1 %2132 }
 0x2ae   : > { %3806 = vpow2.f32 %v2143_v27  ;;  %v2139_v29 = vsub.f32 %v2123_v17, %v2133_v28 }
 0x2b0   : > { %v2145_v30 = vmul.f32 1.442695, %v2139_v29 }
 0x2b1   : > { %v2136_v31 = vpop.xlane.xlu1 %2135 }
 0x2b2   : > { %3808 = vpow2.f32 %v2145_v30  ;;  %v2140_v32 = vsub.f32 %v2124_v19, %v2136_v31 }
 0x2b4   : > { %v3805_v33 = vpop.eup %3804  ;;  %v2147_v34 = vmul.f32 1.442695, %v2140_v32  ;;  %v2796_v32 = vld [vmem:[%s4157_s7] sm:$0xff] }
 0x2b5   : > { %v2149_v35 = vsel %vm1806_vm3, %v3805_v33, 0.0 }
 0x2b6   : > { %3810 = vpow2.f32 %v2147_v34  ;;  %2150 = vadd.xlane.f32.xlu0 %v2149_v35  ;;  %v2799_v35 = vld [vmem:[%s4157_s7 + $0x18] sm:$0xff] }
 0x2b8   : > { %v3807_v36 = vpop.eup %3806 }
 0x2b9   : > { %v2152_v37 = vsel %vm1806_vm3, %v3807_v36, 0.0 }
 0x2ba   : > { %2153 = vadd.xlane.f32.xlu1 %v2152_v37  ;;  %v2881_v37 = vld [vmem:[%s4171_s11] sm:$0xff] }
 0x2bc   : > { %v3809_v38 = vpop.eup %3808 }
 0x2bd   : > { %v2155_v39 = vsel %vm1806_vm3, %v3809_v38, 0.0 }
 0x2be   : > { %2156 = vadd.xlane.f32.xlu0 %v2155_v39  ;;  %v2883_v39 = vld [vmem:[%s4171_s11 + $0x10] sm:$0xff] }
 0x2c0   : > { %v3811_v40 = vpop.eup %3810 }
 0x2c1   : > { %v2158_v41 = vsel %vm1806_vm3, %v3811_v40, 0.0 }
 0x2c2   : > { %2159 = vadd.xlane.f32.xlu1 %v2158_v41  ;;  %v2884_v41 = vld [vmem:[%s4171_s11 + $0x18] sm:$0xff] }
 0x343   : > { %v2151_v42 = vpop.xlane.xlu0 %2150 }
 0x344   : > { %3812 = vrcp.f32 %v2151_v42  ;;  %v3722_v42 = vpack.c.bf16 %v2884_v41, %v2883_v39 }
 0x347   : > { %v2154_v43 = vpop.xlane.xlu1 %2153 }
 0x348   : > { %3814 = vrcp.f32 %v2154_v43  ;;  %v2885_v43 = vld [vmem:[%s4171_s11 + $0x20] sm:$0xff] }
 0x34b   : > { %v2157_v44 = vpop.xlane.xlu0 %2156 }
 0x34c   : > { %3816 = vrcp.f32 %v2157_v44  ;;  %v2886_v44 = vld [vmem:[%s4171_s11 + $0x28] sm:$0xff] }
 0x34d   : > { %v3725_v45 = vpack.c.bf16 %v2886_v44, %v2885_v43 }
 0x34e   : > { %v3813_v46 = vpop.eup %3812 }
 0x34f   : > { %v2165_v47 = vmul.f32 %v3813_v46, %v3805_v33  ;;  %v2160_v48 = vpop.xlane.xlu1 %2159  ;;  %v2797_v33 = vld [vmem:[%s4157_s7 + $0x8] sm:$0xff] }
 0x350   : > { %3818 = vrcp.f32 %v2160_v48  ;;  %v3713_v34 = vpack.c.bf16 %v2797_v33, %v2796_v32 }
 0x351   : > { %3573 = vmatmul.mubr.msk.f32.vlgmr.msra.gmra.mrb[18].mxu0 %vm1806_vm3, %v2165_v47 }
 0x352   : > { %v3815_v51 = vpop.eup %3814  ;;  %3581 = vmatpush3.msra.mxu0 %v1733_v49  ;;  %3582 = vmatprep.mubr.msk.f32.mxu0 %vm3921_vm1, %v3922_v15 }
 0x353   : > { %v2166_v52 = vmul.f32 %v3815_v51, %v3807_v36  ;;  %3590 = vmatprep.subr.mxu0 %v3922_v15 }
 0x355   : > { %3578 = vmatmul.mubr.msk.f32.vlgmr.msra.gmra.mrb[14].mxu1 %vm1806_vm3, %v2166_v52  ;;  %v3304_v52 = vld [vmem:[%s794_s2] ss:$0 sm:$0xff] }
 0x356   : > { %v3817_v54 = vpop.eup %3816  ;;  %3586 = vmatpush3.msra.mxu1 %v1803_v53  ;;  %3587 = vmatprep.mubr.msk.f32.mxu1 %vm3921_vm1, %v3922_v15 }
 0x357   : > { %v2167_v55 = vmul.f32 %v3817_v54, %v3809_v38  ;;  %3595 = vmatprep.subr.mxu1 %v3922_v15  ;;  %v2882_v38 = vld [vmem:[%s4171_s11 + $0x8] sm:$0xff]  ;;  %v2887_v54 = vld [vmem:[%s4171_s11 + $0x30] sm:$0xff] }
 0x359   : > { %3583 = vmatmul.mubr.msk.f32.vlgmr.msra.gmra.mrb[20].mxu0 %vm1806_vm3, %v2167_v55  ;;  %v2888_v55 = vld [vmem:[%s4171_s11 + $0x38] sm:$0xff] }
 0x35a   : > { %v3819_v56 = vpop.eup %3818  ;;  %3592 = vmatprep.mubr.msk.f32.mxu0 %vm3921_vm1, %v3922_v15  ;;  %3591 = vmatpush3.msra.mxu0 %v883_v58 }
 0x35b   : > { %v2168_v57 = vmul.f32 %v3819_v56, %v3811_v40  ;;  %3600 = vmatprep.subr.mxu0 %v3922_v15  ;;  %v3719_v40 = vpack.c.bf16 %v2882_v38, %v2881_v37  ;;  %v3728_v56 = vpack.c.bf16 %v2888_v55, %v2887_v54 }
 0x35d   : > { %3588 = vmatmul.mubr.msk.f32.vlgmr.msra.gmra.mrb[16].mxu1 %vm1806_vm3, %v2168_v57  ;;  %v3305_v57 = vld [vmem:[%s802_s8] ss:$0 sm:$0xff]  ;;  %s4595_s8 = sld [smem:[#allocation9_spill]] }
 0x35e   : > { %3597 = vmatprep.mubr.msk.f32.mxu1 %vm3921_vm1, %v3922_v15  ;;  %3596 = vmatpush3.msra.mxu1 %v884_v59 }
 0x35f   : > { %3605 = vmatprep.subr.mxu1 %v3922_v15 }
 0x363   : > { %p3309_p1 = scmp.ne.s32.totalorder %s4595_s8, 1 }
 0x424   : > { %v2238_v61 = vpop.f32.mrb[18].mxu0 }
 0x425   : > { %v3574_v62 = vpop.f32.mrb[19].mxu0  ;;  %3593 = vmatmul.mubr.msk.f32.vlgmr.msra.gmra.mrb[22].mxu0 %vm1806_vm3, %v2238_v61 }
 0x426   : > { %3601 = vmatpush3.msra.mxu0 %v885_v60  ;;  %3602 = vmatprep.mubr.msk.f32.mxu0 %vm3921_vm1, %v3922_v15  ;;  %v3307_v62 = vld [vmem:[%s810_s10] ss:$0 sm:$0xff] }
 0x427   : > { %3712 = vmatprep.subr.bf16.mxu0 %v3920_v7 }
 0x428   : > { %v2311_v0 = vpop.f32.mrb[14].mxu1 }
 0x429   : > { %v3579_v1 = vpop.f32.mrb[15].mxu1  ;;  %3598 = vmatmul.mubr.msk.f32.vlgmr.msra.gmra.mrb[18].mxu1 %vm1806_vm3, %v2311_v0 }
 0x42a   : > { %3606 = vmatpush3.msra.mxu1 %v886_v63  ;;  %3607 = vmatprep.mubr.msk.f32.mxu1 %vm3921_vm1, %v3922_v15 }
 0x42b   : > { %3718 = vmatprep.subr.bf16.mxu1 %v3920_v7 }
 0x42c   : > { %v2384_v2 = vpop.f32.mrb[20].mxu0 }
 0x42d   : > { %v3584_v3 = vpop.f32.mrb[21].mxu0  ;;  %3603 = vmatmul.mubr.msk.f32.vlgmr.msra.gmra.mrb[24].mxu0 %vm1806_vm3, %v2384_v2 }
 0x42e   : > { %3618 = vmatprep.mubr.msk.f32.mxu0 %vm3921_vm1, %v3922_v15  ;;  %3714 = vmatpush3.bf16.msra.mxu0 %v3713_v34 }
 0x42f   : > { %3715 = vmatprep.subr.bf16.mxu0 %v3920_v7 }
 0x430   : > { %v2457_v4 = vpop.f32.mrb[16].mxu1 }
 0x431   : > { %v3589_v5 = vpop.f32.mrb[17].mxu1  ;;  %3608 = vmatmul.mubr.msk.f32.vlgmr.msra.gmra.mrb[20].mxu1 %vm1806_vm3, %v2457_v4 }
 0x432   : > { %3637 = vmatprep.mubr.msk.f32.mxu1 %vm3921_vm1, %v3922_v15  ;;  %v3302_v15 = vld [vmem:[%s4591_s17] ss:$0 sm:$0xff]  ;;  %3720 = vmatpush3.bf16.msra.mxu1 %v3719_v40 }
 0x433   : > { %3721 = vmatprep.subr.bf16.mxu1 %v3920_v7 }
 0x436   : > { %3723 = vmatpush3.bf16.msra.mxu1 %v3722_v42 }
 0x437   : > { %3724 = vmatprep.subr.bf16.mxu1 %v3920_v7 }
 0x43a   : > { %3726 = vmatpush3.bf16.msra.mxu1 %v3725_v45 }
 0x43b   : > { %3727 = vmatprep.subr.bf16.mxu1 %v3920_v7 }
 0x43e   : > { %3729 = vmatpush3.bf16.msra.mxu1 %v3728_v56 }
 0x4f8   : > { %v2530_v6 = vpop.f32.mrb[22].mxu0 }
 0x4f9   : > { %v3594_v8 = vpop.f32.mrb[23].mxu0  ;;  %v2753_v10 = vsel %vm914_vm2, %v2530_v6, 0.0 }
 0x4fc   : > { %v2603_v9 = vpop.f32.mrb[18].mxu1 }
 0x4fd   : > { %v2754_v11 = vsel %vm914_vm2, %v2603_v9, 0.0  ;;  %v3599_v12 = vpop.f32.mrb[19].mxu1 }
 0x4fe   : > { %v2755_v13 = vadd.f32 %v2754_v11, %v2753_v10 }
 0x500   : > { %v2676_v14 = vpop.f32.mrb[24].mxu0 }
 0x501   : > { %v2756_v16 = vsel %vm914_vm2, %v2676_v14, 0.0  ;;  %v3604_v17 = vpop.f32.mrb[25].mxu0 }
 0x502   : > { %v2757_v18 = vadd.f32 %v2756_v16, %v2755_v13 }
 0x504   : > { %v2749_v19 = vpop.f32.mrb[20].mxu1 }
 0x505   : > { %v2758_v20 = vsel %vm914_vm2, %v2749_v19, 0.0  ;;  %v3609_v21 = vpop.f32.mrb[21].mxu1 }
 0x506   : > { %v2759_v23 = vadd.f32 %v2758_v20, %v2757_v18 }
 0x508   : > { %v2766_v24 = vadd.f32 %v3302_v15, %v2759_v23 }
 0x50a   : > { %v2767_v25 = vadd.f32 %v2766_v24, %v4198_v22  ;;  %v2798_v22 = vld [vmem:[%s4157_s7 + $0x10] sm:$0xff] }
 0x50b   : > { %v3716_v36 = vpack.c.bf16 %v2799_v35, %v2798_v22 }
 0x50c   : > { %v2768_v26 = vsel %vm914_vm2, %v2767_v25, 0.0 }
 0x50d   : > { %2769 = vadd.xlane.f32.xlu0 %v2768_v26  ;;  %3717 = vmatpush3.bf16.msra.mxu0 %v3716_v36 }
 0x59a   : > { %v2770_v27 = vpop.xlane.xlu0 %2769 }
 0x59b   : > { %v2772_v28 = vmul.f32 0.03125, %v2770_v27 }
 0x59d   : > { %v2773_v29 = vsub.f32 %v2767_v25, %v2772_v28 }
 0x59f   : > { %v2774_v30 = vmul.f32 %v2773_v29, %v2773_v29 }
 0x5a1   : > { %v2775_v31 = vsel %vm914_vm2, %v2774_v30, 0.0 }
 0x5a2   : > { %2776 = vadd.xlane.f32.xlu1 %v2775_v31 }
 0x62f   : > { %v2777_v46 = vpop.xlane.xlu1 %2776 }
 0x630   : > { %v2778_v47 = vmul.f32 0.03125, %v2777_v46 }
 0x632   : > { %v2779_v48 = vadd.f32 1e-05, %v2778_v47 }
 0x634   : > { %3820 = vrsqrt.f32 %v2779_v48 }
 0x63e   : > { %v3821_v49 = vpop.eup %3820 }
 0x63f   : > { %v2781_v51 = vmul.f32 %v3821_v49, %v2773_v29 }
 0x641   : > { %v2788_v53 = vmul.f32 %v3303_v50, %v2781_v51 }
 0x643   : > { %v2795_v7 = vadd.f32 %v3304_v52, %v2788_v53 }
 0x645   : > { %3619 = vmatmul.mubr.msk.f32.vlgmr.msra.gmra.mrb[26].mxu0 %vm914_vm2, %v2795_v7 }
 0x718   : > { %v2876_v58 = vpop.f32.mrb[26].mxu0 }
 0x719   : > { %v2877_v59 = vadd.f32 %v3305_v57, %v2876_v58  ;;  %v3620_v60 = vpop.f32.mrb[27].mxu0 }
 0x71b   : > { %v2880_v61 = vmax.f32 %v2877_v59, 0.0 }
 0x71d   : > { %3638 = vmatmul.mubr.msk.f32.vlgmr.msra.gmra.mrb[22].mxu1 %vm2896_vm4, %v2880_v61 }
 0x7f0   : > { %v2966_v63 = vpop.f32.mrb[22].mxu1 }
 0x7f1   : > { %v2967_v0 = vadd.f32 %v3307_v62, %v2966_v63  ;;  %v3639_v1 = vpop.f32.mrb[23].mxu1 }
 0x7f3   : > { %v2970_v2 = vadd.f32 %v2967_v0, %v2795_v7 }
 0x7f5   : > { %v2971_v3 = vsel %vm914_vm2, %v2970_v2, 0.0 }
 0x7f6   : > { %2972 = vadd.xlane.f32.xlu0 %v2971_v3 }
 0x883   : > { %v2973_v4 = vpop.xlane.xlu0 %2972 }
 0x884   : > { %v2974_v5 = vmul.f32 0.03125, %v2973_v4 }
 0x886   : > { %v2975_v6 = vsub.f32 %v2970_v2, %v2974_v5 }
 0x888   : > { %v2976_v8 = vmul.f32 %v2975_v6, %v2975_v6 }
 0x88a   : > { %v2977_v9 = vsel %vm914_vm2, %v2976_v8, 0.0 }
 0x88b   : > { %2978 = vadd.xlane.f32.xlu1 %v2977_v9 }
 0x918   : > { %v2979_v10 = vpop.xlane.xlu1 %2978 }
 0x919   : > { %v2980_v11 = vmul.f32 0.03125, %v2979_v10 }
 0x91b   : > { %v2981_v12 = vadd.f32 1e-05, %v2980_v11 }
 0x91d   : > { %3822 = vrsqrt.f32 %v2981_v12 }
 0x927   : > { %v3823_v13 = vpop.eup %3822 }
 0x928   : > { %v2983_v14 = vmul.f32 %v3823_v13, %v2975_v6  ;;  %2990 = sbr.rel (%p3309_p1) target bundleno = 2351 (0x92f), region = 96 }
 0x92a   : > { %v2984_v16 = vmul.f32 %v3303_v50, %v2983_v14 }
 0x92c   : > { %v2985_v17 = vadd.f32 %v3304_v52, %v2984_v16 }
 0x92e   : > { %2986 = vst.msk [vmem:[#allocation2] sm:$0xff] %vm914_vm2, %v2985_v17  ;;  %2991 = vst.msk [vmem:[%s746_s25] sm:$0xff] (!%p3309_p1), %vm914_vm2, %v2985_v17 }
 0x92f PF: > { %s4596_s10 = sld [smem:[#allocation10_spill]]  ;;  %s4597_s11 = sld [smem:[#allocation7_spill]] }
 0x930   : > { %s4599_s28 = sld [smem:[#allocation35_spill]]  ;;  %s3006_s26 = sshll.u32 %s746_s25, 4  ;;  %s3007_s26 = int_to_ptr.vmem [resolvable:$true] %s3006_s26 }
 0x931   : > { %s3824_s19 = scalar_lea.vmem %s3007_s26, 128  ;;  %s3923_s17 = smov [#allocation3]  }
 0x932   : > { %p3825_p2 = scmp.ne.s32.totalorder %s3007_s26, %s3824_s19  ;;  %s3828_s7 = sshll.u32 %s3923_s17, 4  ;;  %s3829_s7 = int_to_ptr.vmem [resolvable:$false] %s3828_s7 }
 0x933   : > { %s3830_s22 = scalar_lea.vmem %s3829_s7, 256  ;;  %p3831_p6 = scmp.lt.s32.totalorder %s3007_s26, %s3829_s7 }
 0x934   : > { %p3826_p4 = pnand %p3825_p2, %p4063_p3  ;;  %p3832_p7 = scmp.lt.s32.totalorder %s3830_s22, %s3824_s19 }
 0x935   : > { %s3311_s15 = sshll.u32 %s4596_s10, 7  ;;  %s4601_s16 = sand.u32 1, %s4597_s11  }
 0x936   : > { %s4600_s18 = smov %s4599_s28  ;;  %s4453_s30 = scalar_lea.hbm %s4599_s28, %s3311_s15 }
 0x937   : > { %s2993_s20 = scalar_lea.sflag [#allocation4], %s4601_s16  ;;  %p3827_p5 = pneg %p3826_p4 }
 0x938   : > { %p3833_p8 = por %p3832_p7, %p3831_p6 }
 0x93a   : > { %p3834_p10 = pnand %p3833_p8, %p3827_p5 }
 0x93c   : > { %3837 = shalt.err (!%p3834_p10)
}
 0x93d   : > { %s3838_s29 = scalar_lea.hbm %s4453_s30, 128  ;;  %s3842_s5 = scalar_lea.hbm %s4600_s18, 256 }
 0x93e   : > { %p3839_p11 = scmp.ne.s32.totalorder %s4453_s30, %s3838_s29  ;;  %p3843_p0 = scmp.lt.u32.totalorder %s4453_s30, %s4600_s18 }
 0x93f   : > { %p3844_p1 = scmp.lt.u32.totalorder %s3842_s5, %s3838_s29  ;;  %p3846_p4 = scmp.lt.u32.totalorder %s3838_s29, %s4453_s30 }
 0x940   : > { %p3840_p12 = pnand %p3839_p11, %p4063_p3 }
 0x941   : > { %p3845_p2 = por %p3844_p1, %p3843_p0 }
 0x942   : > { %p3841_p13 = pneg %p3840_p12 }
 0x943   : > { %p3847_p5 = por %p3846_p4, %p3845_p2 }
 0x945   : > { %p3848_p6 = pnand %p3847_p5, %p3841_p13 }
 0x947   : > { %3851 = shalt.err (!%p3848_p6)
}
 0x948   : > { %3730 = dma.vmem_to_hbm [thread:$0]  (%p4063_p3), %s3007_s26, 128, %s4453_s30, %s2993_s20  }
 0x949 PF: > { %s4602_s0 = sld [smem:[#allocation13_spill]]  ;;  %s4603_s21 = sld [smem:[#allocation6_spill]] }
 0x94f   : > { %p3736_p7 = scmp.ge.s32.totalorder %s4602_s0, 2  ;;  %s3018_s4 = sand.u32 1, %s4603_s21  }
 0x950   : > { %s3019_s27 = scalar_lea.sflag [#allocation4], %s3018_s4 }
 0x951   : > { %p3733_p8 = pnand %p3736_p7, %p4073_p9 }
 0x953   : > { %3885 = dma.done.wait (!%p3733_p8), %s3019_s27, 128  }
 0x954   : > { %3887 = vsyncadd (!%p3733_p8), %s3019_s27, 4294967168  ;;  %s30_s30 = sadd.s32 1, %s4602_s0   ;;  %s4605_s24 = sld [smem:[#allocation7_spill]] }
 0x955   : > { %p27_p10 = scmp.ge.s32.totalorder %s30_s30, 6   ;;  %s4606_s25 = sld [smem:[#allocation8_spill]] }
 0x956   : > { %s4607_s26 = sld [smem:[#allocation18_spill]]  ;;  %s4608_s27 = sld [smem:[#allocation11_spill]] }
 0x957   : > { %s4609_s28 = sld [smem:[#allocation12_spill]]  ;;  %s4610_s29 = sld [smem:[#allocation14_spill]] }
 0x958   : > { %s4611_s0 = sld [smem:[#allocation16_spill]]  ;;  %29 = sbr.rel (!%p27_p10) target bundleno = 21 (0x15), region = 176 }
 0x95f   :  { %3024 = vsyncpa [#allocation4], 1 }
 0x960   :  { %3026 = vsyncpa [#allocation4 + $0x1], 1 }

</bundles_post_ra>
